<compile_context>
chip_gen: v5e
topology: v5e:2x2
jax: 0.10.0
libtpu: 0.0.40
codegen_flags: <defaults>
</compile_context>

<pallas_src>
import functools

import jax
import jax.numpy as jnp
from jax.experimental import pallas as pl
from jax.experimental.pallas import tpu as pltpu

EPS = 1e-5  # PyTorch BatchNorm1d default eps


def legnn_kernel(x_ref, A_ref, deg_ref, mmask_ref, w0_ref, b0_ref,
                 wrest_ref, brest_ref, gamma_ref, beta_ref, out_ref,
                 *, num_unit, hp, agg_bf16):
    A = A_ref[...]                      # (Np, Np) dense weighted adjacency (dst, src)
    np_rows = A.shape[0]

    # Hoist broadcasts out of the unit loop (JAX does not CSE broadcast_in_dim).
    deg_full = jnp.broadcast_to(deg_ref[...], (np_rows, hp))        # weighted in-degree
    mmask_full = jnp.broadcast_to(mmask_ref[...], (np_rows, hp))    # 1/N on real rows

    # Aggregation matmul operand; optional bf16 path (v6e/v7x) with f32 accumulate.
    A_mm = A.astype(jnp.bfloat16) if agg_bf16 else A

    h = x_ref[...]                      # (Np, F_in); node_emb is folded into w0/b0

    for i in range(num_unit):           # static Python unroll (num_unit = 2)
        # Fused lin1|lin2|lin3: one matmul, then lane-aligned (multiple-of-128) slices.
        if i == 0:
            y = jnp.dot(h, w0_ref[...], preferred_element_type=jnp.float32) + b0_ref[...]
        else:
            y = (jnp.dot(h, wrest_ref[i - 1], preferred_element_type=jnp.float32)
                 + brest_ref[i - 1])
        a = y[:, 0 * hp:1 * hp]         # lin1(h) + b1
        b = y[:, 1 * hp:2 * hp]         # lin2(h)        (no bias)
        c = y[:, 2 * hp:3 * hp]         # lin3(h) + b3

        # message + add-aggregation: (A @ a)_i - deg_i * b_i + c_i
        a_mm = a.astype(jnp.bfloat16) if agg_bf16 else a
        agg = jnp.dot(A_mm, a_mm, preferred_element_type=jnp.float32)
        out = agg - deg_full * b + c

        # BatchNorm1d (training-mode batch stats) over the REAL rows only.
        masked = out * mmask_full                                   # out / N on real rows
        mean = jnp.sum(masked, axis=0, keepdims=True)
        ex2 = jnp.sum(masked * out, axis=0, keepdims=True)
        var = jnp.maximum(ex2 - mean * mean, 0.0)
        scale = gamma_ref[i] * jax.lax.rsqrt(var + EPS)   # padded channels: gamma=0 -> 0
        shift = beta_ref[i] - mean * scale
        out = out * scale + shift

        if i != num_unit - 1:
            out = jnp.maximum(out, 0.0)
        h = out

    out_ref[...] = h                    # (Np, Hp): lane-dense, unmasked stores


def _round_up(n, m):
    return ((n + m - 1) // m) * m


def legnn_forward(x, edge_index, edge_weight, params, *, num_unit=2, agg_bf16=False):
    """x: (N, F_in) f32; edge_index: (2, E) int32 [src; dst]; edge_weight: (E,) f32."""
    N, F_in = x.shape
    H = params["w_emb"].shape[1]
    Np = _round_up(N, 128)   # fill the MXU M dimension / lane-dense row padding
    Hp = _round_up(H, 128)   # lane-dense hidden dimension

    # Glue (plain JAX): dense weighted adjacency + weighted in-degree, zero-padded.
    src, dst = edge_index[0], edge_index[1]
    A = jnp.zeros((Np, Np), jnp.float32).at[dst, src].add(edge_weight)
    deg = jnp.sum(A, axis=1, keepdims=True)                 # (Np, 1)

    x_p = jnp.zeros((Np, F_in), jnp.float32).at[:N].set(x)

    w_emb = jnp.zeros((F_in, Hp), jnp.float32).at[:, :H].set(params["w_emb"])
    b_emb = jnp.zeros((1, Hp), jnp.float32).at[:, :H].set(params["b_emb"])

    # Fuse lin1 | lin2 | lin3 into one (Hp, 3*Hp) weight and one (1, 3*Hp) bias per unit.
    w_cat = jnp.zeros((num_unit, Hp, 3 * Hp), jnp.float32)
    b_cat = jnp.zeros((num_unit, 1, 3 * Hp), jnp.float32)
    for i in range(num_unit):
        w_cat = w_cat.at[i, :H, 0 * Hp:0 * Hp + H].set(params["w1"][i])
        w_cat = w_cat.at[i, :H, 1 * Hp:1 * Hp + H].set(params["w2"][i])
        w_cat = w_cat.at[i, :H, 2 * Hp:2 * Hp + H].set(params["w3"][i])
        b_cat = b_cat.at[i, :, 0 * Hp:0 * Hp + H].set(params["b1"][i])
        b_cat = b_cat.at[i, :, 2 * Hp:2 * Hp + H].set(params["b3"][i])

    # Fold node_emb into unit 0's fused projection (host-side, tiny, exact in math):
    #   (x @ W_emb + b_emb) @ Wcat0 + bcat0 == x @ (W_emb @ Wcat0) + (b_emb @ Wcat0 + bcat0)
    w0 = w_emb @ w_cat[0]                                   # (F_in, 3*Hp)
    b0 = b_emb @ w_cat[0] + b_cat[0]                        # (1, 3*Hp)
    if num_unit > 1:
        w_rest, b_rest = w_cat[1:], b_cat[1:]
    else:  # placeholder, never read inside the kernel
        w_rest = jnp.zeros((1, Hp, 3 * Hp), jnp.float32)
        b_rest = jnp.zeros((1, 1, 3 * Hp), jnp.float32)

    # Pad gamma/beta with zeros so padded channels stay exactly zero after BN.
    gamma = jnp.zeros((num_unit, 1, Hp), jnp.float32).at[:, :, :H].set(params["gamma"])
    beta = jnp.zeros((num_unit, 1, Hp), jnp.float32).at[:, :, :H].set(params["beta"])

    # Masked-mean weights: 1/N on the real rows, 0 on padding rows, so
    # sum(out * mmask, axis=0) is exactly the BatchNorm1d batch mean.
    mmask = jnp.zeros((Np, 1), jnp.float32).at[:N].set(1.0 / N)

    vmem = pl.BlockSpec(memory_space=pltpu.MemorySpace.VMEM)
    ins = (x_p, A, deg, mmask, w0, b0, w_rest, b_rest, gamma, beta)

    flops = (2 * Np * F_in * 3 * Hp                       # folded unit-0 projection
             + max(num_unit - 1, 0) * 2 * Np * Hp * 3 * Hp  # remaining fused projections
             + num_unit * 2 * Np * Np * Hp)               # aggregation matmuls
    bytes_accessed = 4 * (sum(int(a.size) for a in ins) + Np * Hp)
    cost = pl.CostEstimate(flops=flops, transcendentals=num_unit * Hp,
                           bytes_accessed=bytes_accessed)

    out_p = pl.pallas_call(
        functools.partial(legnn_kernel, num_unit=num_unit, hp=Hp, agg_bf16=agg_bf16),
        out_shape=jax.ShapeDtypeStruct((Np, Hp), jnp.float32),
        in_specs=[vmem] * len(ins),
        out_specs=vmem,
        cost_estimate=cost,
    )(*ins)
    return out_p[:N, :H]


def legnn_reference(x, edge_index, edge_weight, params, num_unit):
    """Pure-JAX reference (unpadded), mirrors the PyTorch module forward."""
    N = x.shape[0]
    src, dst = edge_index[0], edge_index[1]
    A = jnp.zeros((N, N), jnp.float32).at[dst, src].add(edge_weight)
    deg = jnp.sum(A, axis=1, keepdims=True)
    h = x @ params["w_emb"] + params["b_emb"]
    for i in range(num_unit):
        a = h @ params["w1"][i] + params["b1"][i]
        b = h @ params["w2"][i]
        c = h @ params["w3"][i] + params["b3"][i]
        out = A @ a - deg * b + c
        mean = jnp.mean(out, axis=0, keepdims=True)
        var = jnp.mean((out - mean) ** 2, axis=0, keepdims=True)
        out = (out - mean) * jax.lax.rsqrt(var + EPS) * params["gamma"][i] + params["beta"][i]
        if i != num_unit - 1:
            out = jnp.maximum(out, 0.0)
        h = out
    return h


def init_params(key, in_channels, hid_channels, num_unit):
    ks = jax.random.split(key, 8)
    u = lambda k, shape, s=0.1: jax.random.uniform(k, shape, jnp.float32, -s, s)
    return {
        "w_emb": u(ks[0], (in_channels, hid_channels)),
        "b_emb": u(ks[1], (1, hid_channels)),
        "w1":    u(ks[2], (num_unit, hid_channels, hid_channels)),
        "b1":    u(ks[3], (num_unit, 1, hid_channels)),
        "w2":    u(ks[4], (num_unit, hid_channels, hid_channels)),
        "w3":    u(ks[5], (num_unit, hid_channels, hid_channels)),
        "b3":    u(ks[6], (num_unit, 1, hid_channels)),
        "gamma": jnp.ones((num_unit, 1, hid_channels), jnp.float32),
        "beta":  jnp.zeros((num_unit, 1, hid_channels), jnp.float32),
    }


if __name__ == "__main__":
    N, F_IN, HID, NUM_UNIT, E = 32, 4, 64, 2, 96

    key = jax.random.PRNGKey(0)
    k_x, k_ei, k_ew, k_p = jax.random.split(key, 4)

    x = jax.random.normal(k_x, (N, F_IN), jnp.float32)
    edge_index = jax.random.randint(k_ei, (2, E), 0, N, jnp.int32)     # [src; dst]
    edge_weight = jax.random.uniform(k_ew, (E,), jnp.float32)          # scalar edge_attr
    params = init_params(k_p, F_IN, HID, NUM_UNIT)

    # agg_bf16=False keeps full-f32 aggregation (flip to True on v6e/v7x if the
    # ~1e-2 relative shift from bf16 A / lin1(h) is acceptable).
    node_x = legnn_forward(x, edge_index, edge_weight, params,
                           num_unit=NUM_UNIT, agg_bf16=False)
    jax.block_until_ready(node_x)

    ref = legnn_reference(x, edge_index, edge_weight, params, NUM_UNIT)
    assert node_x.shape == (N, HID) and node_x.dtype == jnp.float32
    assert bool(jnp.allclose(node_x, ref, rtol=1e-2, atol=1e-2))
    print("KERNEL_OK")
</pallas_src>

<mosaic_0001>
module attributes {stable_mosaic.version = 11 : i64} {
  func.func @legnn_kernel(%arg0: memref<128x4xf32, #tpu.memory_space<vmem>>, %arg1: memref<128x128xf32, #tpu.memory_space<vmem>>, %arg2: memref<128x1xf32, #tpu.memory_space<vmem>>, %arg3: memref<128x1xf32, #tpu.memory_space<vmem>>, %arg4: memref<4x384xf32, #tpu.memory_space<vmem>>, %arg5: memref<1x384xf32, #tpu.memory_space<vmem>>, %arg6: memref<1x128x384xf32, #tpu.memory_space<vmem>>, %arg7: memref<1x1x384xf32, #tpu.memory_space<vmem>>, %arg8: memref<2x1x128xf32, #tpu.memory_space<vmem>>, %arg9: memref<2x1x128xf32, #tpu.memory_space<vmem>>, %arg10: memref<128x128xf32, #tpu.memory_space<vmem>>) attributes {dimension_semantics = [], scalar_prefetch = 0 : i64, scratch_operands = 0 : i64, tpu.core_type = #tpu.core_type<tc>} {
    %c0 = arith.constant 0 : index
    %c0_0 = arith.constant 0 : index
    %0 = vector.load %arg1[%c0, %c0_0] : memref<128x128xf32, #tpu.memory_space<vmem>>, vector<128x128xf32>
    %c0_1 = arith.constant 0 : index
    %c0_2 = arith.constant 0 : index
    %1 = vector.load %arg2[%c0_1, %c0_2] : memref<128x1xf32, #tpu.memory_space<vmem>>, vector<128x1xf32>
    %2 = vector.shape_cast %1 : vector<128x1xf32> to vector<128x1xf32>
    %3 = vector.broadcast %2 : vector<128x1xf32> to vector<128x128xf32>
    %c0_3 = arith.constant 0 : index
    %c0_4 = arith.constant 0 : index
    %4 = vector.load %arg3[%c0_3, %c0_4] : memref<128x1xf32, #tpu.memory_space<vmem>>, vector<128x1xf32>
    %5 = vector.shape_cast %4 : vector<128x1xf32> to vector<128x1xf32>
    %6 = vector.broadcast %5 : vector<128x1xf32> to vector<128x128xf32>
    %c0_5 = arith.constant 0 : index
    %c0_6 = arith.constant 0 : index
    %7 = vector.load %arg0[%c0_5, %c0_6] : memref<128x4xf32, #tpu.memory_space<vmem>>, vector<128x4xf32>
    %c0_7 = arith.constant 0 : index
    %c0_8 = arith.constant 0 : index
    %8 = vector.load %arg4[%c0_7, %c0_8] : memref<4x384xf32, #tpu.memory_space<vmem>>, vector<4x384xf32>
    %cst = arith.constant dense<0.000000e+00> : vector<128x384xf32>
    %9 = tpu.matmul %7, %8, %cst {dimension_numbers = #tpu.dot_dimension_numbers<[1], [0], [0], [1], [0, 0, 1, 1], [], []>} : vector<128x4xf32>, vector<4x384xf32>, vector<128x384xf32> -> vector<128x384xf32>
    %c0_9 = arith.constant 0 : index
    %c0_10 = arith.constant 0 : index
    %10 = vector.load %arg5[%c0_9, %c0_10] : memref<1x384xf32, #tpu.memory_space<vmem>>, vector<1x384xf32>
    %11 = vector.broadcast %10 : vector<1x384xf32> to vector<128x384xf32>
    %12 = arith.addf %9, %11 : vector<128x384xf32>
    %13 = vector.extract_strided_slice %12 {offsets = [0, 0], sizes = [128, 128], strides = [1, 1]} : vector<128x384xf32> to vector<128x128xf32>
    %14 = vector.extract_strided_slice %12 {offsets = [0, 128], sizes = [128, 128], strides = [1, 1]} : vector<128x384xf32> to vector<128x128xf32>
    %15 = vector.extract_strided_slice %12 {offsets = [0, 256], sizes = [128, 128], strides = [1, 1]} : vector<128x384xf32> to vector<128x128xf32>
    %cst_11 = arith.constant dense<0.000000e+00> : vector<128x128xf32>
    %16 = tpu.matmul %0, %13, %cst_11 {dimension_numbers = #tpu.dot_dimension_numbers<[1], [0], [0], [1], [0, 0, 1, 1], [], []>} : vector<128x128xf32>, vector<128x128xf32>, vector<128x128xf32> -> vector<128x128xf32>
    %17 = arith.mulf %3, %14 : vector<128x128xf32>
    %18 = arith.subf %16, %17 : vector<128x128xf32>
    %19 = arith.addf %18, %15 : vector<128x128xf32>
    %20 = arith.mulf %19, %6 : vector<128x128xf32>
    %cst_12 = arith.constant dense<0.000000e+00> : vector<128xf32>
    %21 = vector.multi_reduction <add>, %20, %cst_12 [0] : vector<128x128xf32> to vector<128xf32>
    %22 = vector.shape_cast %21 : vector<128xf32> to vector<1x128xf32>
    %23 = arith.mulf %20, %19 : vector<128x128xf32>
    %cst_13 = arith.constant dense<0.000000e+00> : vector<128xf32>
    %24 = vector.multi_reduction <add>, %23, %cst_13 [0] : vector<128x128xf32> to vector<128xf32>
    %25 = vector.shape_cast %24 : vector<128xf32> to vector<1x128xf32>
    %26 = arith.mulf %22, %22 : vector<1x128xf32>
    %27 = arith.subf %25, %26 : vector<1x128xf32>
    %cst_14 = arith.constant 0.000000e+00 : f32
    %28 = vector.broadcast %cst_14 : f32 to vector<1x128xf32>
    %29 = arith.maximumf %27, %28 : vector<1x128xf32>
    %c0_15 = arith.constant 0 : index
    %c0_16 = arith.constant 0 : index
    %c0_17 = arith.constant 0 : index
    %30 = vector.load %arg8[%c0_15, %c0_16, %c0_17] : memref<2x1x128xf32, #tpu.memory_space<vmem>>, vector<1x1x128xf32>
    %31 = vector.shape_cast %30 : vector<1x1x128xf32> to vector<1x128xf32>
    %cst_18 = arith.constant 9.99999974E-6 : f32
    %32 = vector.broadcast %cst_18 : f32 to vector<1x128xf32>
    %33 = arith.addf %29, %32 : vector<1x128xf32>
    %34 = math.rsqrt %33 : vector<1x128xf32>
    %35 = arith.mulf %31, %34 : vector<1x128xf32>
    %c0_19 = arith.constant 0 : index
    %c0_20 = arith.constant 0 : index
    %c0_21 = arith.constant 0 : index
    %36 = vector.load %arg9[%c0_19, %c0_20, %c0_21] : memref<2x1x128xf32, #tpu.memory_space<vmem>>, vector<1x1x128xf32>
    %37 = vector.shape_cast %36 : vector<1x1x128xf32> to vector<1x128xf32>
    %38 = arith.mulf %22, %35 : vector<1x128xf32>
    %39 = arith.subf %37, %38 : vector<1x128xf32>
    %40 = vector.broadcast %35 : vector<1x128xf32> to vector<128x128xf32>
    %41 = arith.mulf %19, %40 : vector<128x128xf32>
    %42 = vector.broadcast %39 : vector<1x128xf32> to vector<128x128xf32>
    %43 = arith.addf %41, %42 : vector<128x128xf32>
    %cst_22 = arith.constant 0.000000e+00 : f32
    %44 = vector.broadcast %cst_22 : f32 to vector<128x128xf32>
    %45 = arith.maximumf %43, %44 : vector<128x128xf32>
    %c0_23 = arith.constant 0 : index
    %c0_24 = arith.constant 0 : index
    %c0_25 = arith.constant 0 : index
    %46 = vector.load %arg6[%c0_23, %c0_24, %c0_25] : memref<1x128x384xf32, #tpu.memory_space<vmem>>, vector<1x128x384xf32>
    %47 = vector.shape_cast %46 : vector<1x128x384xf32> to vector<128x384xf32>
    %cst_26 = arith.constant dense<0.000000e+00> : vector<128x384xf32>
    %48 = tpu.matmul %45, %47, %cst_26 {dimension_numbers = #tpu.dot_dimension_numbers<[1], [0], [0], [1], [0, 0, 1, 1], [], []>} : vector<128x128xf32>, vector<128x384xf32>, vector<128x384xf32> -> vector<128x384xf32>
    %c0_27 = arith.constant 0 : index
    %c0_28 = arith.constant 0 : index
    %c0_29 = arith.constant 0 : index
    %49 = vector.load %arg7[%c0_27, %c0_28, %c0_29] : memref<1x1x384xf32, #tpu.memory_space<vmem>>, vector<1x1x384xf32>
    %50 = vector.shape_cast %49 : vector<1x1x384xf32> to vector<1x384xf32>
    %51 = vector.broadcast %50 : vector<1x384xf32> to vector<128x384xf32>
    %52 = arith.addf %48, %51 : vector<128x384xf32>
    %53 = vector.extract_strided_slice %52 {offsets = [0, 0], sizes = [128, 128], strides = [1, 1]} : vector<128x384xf32> to vector<128x128xf32>
    %54 = vector.extract_strided_slice %52 {offsets = [0, 128], sizes = [128, 128], strides = [1, 1]} : vector<128x384xf32> to vector<128x128xf32>
    %55 = vector.extract_strided_slice %52 {offsets = [0, 256], sizes = [128, 128], strides = [1, 1]} : vector<128x384xf32> to vector<128x128xf32>
    %cst_30 = arith.constant dense<0.000000e+00> : vector<128x128xf32>
    %56 = tpu.matmul %0, %53, %cst_30 {dimension_numbers = #tpu.dot_dimension_numbers<[1], [0], [0], [1], [0, 0, 1, 1], [], []>} : vector<128x128xf32>, vector<128x128xf32>, vector<128x128xf32> -> vector<128x128xf32>
    %57 = arith.mulf %3, %54 : vector<128x128xf32>
    %58 = arith.subf %56, %57 : vector<128x128xf32>
    %59 = arith.addf %58, %55 : vector<128x128xf32>
    %60 = arith.mulf %59, %6 : vector<128x128xf32>
    %cst_31 = arith.constant dense<0.000000e+00> : vector<128xf32>
    %61 = vector.multi_reduction <add>, %60, %cst_31 [0] : vector<128x128xf32> to vector<128xf32>
    %62 = vector.shape_cast %61 : vector<128xf32> to vector<1x128xf32>
    %63 = arith.mulf %60, %59 : vector<128x128xf32>
    %cst_32 = arith.constant dense<0.000000e+00> : vector<128xf32>
    %64 = vector.multi_reduction <add>, %63, %cst_32 [0] : vector<128x128xf32> to vector<128xf32>
    %65 = vector.shape_cast %64 : vector<128xf32> to vector<1x128xf32>
    %66 = arith.mulf %62, %62 : vector<1x128xf32>
    %67 = arith.subf %65, %66 : vector<1x128xf32>
    %cst_33 = arith.constant 0.000000e+00 : f32
    %68 = vector.broadcast %cst_33 : f32 to vector<1x128xf32>
    %69 = arith.maximumf %67, %68 : vector<1x128xf32>
    %c1 = arith.constant 1 : index
    %c0_34 = arith.constant 0 : index
    %c0_35 = arith.constant 0 : index
    %70 = vector.load %arg8[%c1, %c0_34, %c0_35] : memref<2x1x128xf32, #tpu.memory_space<vmem>>, vector<1x1x128xf32>
    %71 = vector.shape_cast %70 : vector<1x1x128xf32> to vector<1x128xf32>
    %cst_36 = arith.constant 9.99999974E-6 : f32
    %72 = vector.broadcast %cst_36 : f32 to vector<1x128xf32>
    %73 = arith.addf %69, %72 : vector<1x128xf32>
    %74 = math.rsqrt %73 : vector<1x128xf32>
    %75 = arith.mulf %71, %74 : vector<1x128xf32>
    %c1_37 = arith.constant 1 : index
    %c0_38 = arith.constant 0 : index
    %c0_39 = arith.constant 0 : index
    %76 = vector.load %arg9[%c1_37, %c0_38, %c0_39] : memref<2x1x128xf32, #tpu.memory_space<vmem>>, vector<1x1x128xf32>
    %77 = vector.shape_cast %76 : vector<1x1x128xf32> to vector<1x128xf32>
    %78 = arith.mulf %62, %75 : vector<1x128xf32>
    %79 = arith.subf %77, %78 : vector<1x128xf32>
    %80 = vector.broadcast %75 : vector<1x128xf32> to vector<128x128xf32>
    %81 = arith.mulf %59, %80 : vector<128x128xf32>
    %82 = vector.broadcast %79 : vector<1x128xf32> to vector<128x128xf32>
    %83 = arith.addf %81, %82 : vector<128x128xf32>
    %c0_40 = arith.constant 0 : index
    %c0_41 = arith.constant 0 : index
    %84 = vector.load %arg10[%c0_40, %c0_41] : memref<128x128xf32, #tpu.memory_space<vmem>>, vector<128x128xf32>
    tpu.vector_store %arg10[%c0_40, %c0_41], %83 {strides = array<i32>} : memref<128x128xf32, #tpu.memory_space<vmem>>, vector<128x128xf32>,
    return
  }
}

</mosaic_0001>

<bundles_post_ra>
// kernel: tpu_custom_call.1
= control target key start
LH: loop header
LB: loop body
LE: loop exit
PB: predicated region body
PF: predicated region fallthrough
CT: control target
= control target key end

     0   :  { %15 = vsyncpa [#allocation3], 0  ;;  %s2598_s0 = inlined_call_operand.vmem [shape: f32[128,4], index: 0, kind: input, shape index: {}]   ;;  %s2599_s1 = inlined_call_operand.hbm [shape: f32[128,128], index: 1, kind: input, shape index: {}]   ;;  %s2600_s2 = inlined_call_operand.vmem [shape: f32[128,1], index: 2, kind: input, shape index: {}]   ;;  %s2601_s3 = inlined_call_operand.vmem [shape: f32[128,1], index: 3, kind: input, shape index: {}]   ;;  %s2602_s4 = inlined_call_operand.hbm [shape: f32[4,384], index: 4, kind: input, shape index: {}]   ;;  %s2603_s5 = inlined_call_operand.vmem [shape: f32[1,384], index: 5, kind: input, shape index: {}]   ;;  %s2604_s6 = inlined_call_operand.vmem [shape: f32[1,128,384], index: 6, kind: input, shape index: {}]   ;;  %s2605_s7 = inlined_call_operand.vmem [shape: f32[1,1,384], index: 7, kind: input, shape index: {}]   ;;  %s2606_s8 = inlined_call_operand.vmem [shape: f32[2,1,128], index: 8, kind: input, shape index: {}]   ;;  %s2607_s9 = inlined_call_operand.vmem [shape: f32[2,1,128], index: 9, kind: input, shape index: {}]   ;;  %s2608_s10 = inlined_call_operand.hbm [shape: f32[128,128], index: 10, kind: output, shape index: {}]  }
   0x1   :  { %16 = vsyncpa [#allocation6], 0 }
   0x2   :  { %17 = vsyncpa [#allocation4], 0  ;;  %s24_s15 = sshll.u32 %s2599_s1, 4  ;;  %s1529_s16 = smov [#allocation2]   ;;  %s25_s15 = int_to_ptr.hbm [resolvable:$true] %s24_s15 }
   0x3   :  { %s26_s17 = sshll.u32 %s1529_s16, 4  ;;  %s42_s20 = sshll.u32 %s2602_s4, 4  ;;  %s27_s17 = int_to_ptr.vmem [resolvable:$true] %s26_s17  ;;  %s43_s20 = int_to_ptr.hbm [resolvable:$true] %s42_s20 }
   0x4   :  { %s1530_s21 = smov 128   ;;  %s1531_s22 = smov 8  }
   0x5   :  { %32 = dma.hbm_to_vmem [thread:$0]  %s25_s15, 2048, %s27_s17, [#allocation3], %s1530_s21, %s1530_s21, %s1531_s22  }
   0x6   :  { %s1532_s23 = smov [#allocation5]  }
   0x7   :  { %s44_s24 = sshll.u32 %s1532_s23, 4  ;;  %s45_s24 = int_to_ptr.vmem [resolvable:$true] %s44_s24 }
   0x8   :  { %47 = dma.hbm_to_vmem [thread:$0]  %s43_s20, 192, %s45_s24, [#allocation6]  }
   0x9   :  { %1523 = dma.done.wait [#allocation3], 2048  }
   0xa   :  { %1524 = vsyncadd [#allocation3], 4294965248 }
   0xb   :  { %1525 = dma.done.wait [#allocation6], 192  }
   0xc   :  { %1526 = vsyncadd [#allocation6], 4294967104  ;;  %v290_v0 = vld [vmem:[#allocation5] sm:$0xff]  ;;  %vm357_vm0 = vcmask 1043456   ;;  %v1602_v1 = vld [vmem:[%s2598_s0] sm:$0xff]  ;;  %vm308_vm1 = vcmask 31744  }
   0xd   :  { %302 = vst [vmem:[#allocation1] ss:$2 sm:$0xff] %v290_v0  ;;  %v1611_v3 = vld [vmem:[%s2598_s0 + $0x8] sm:$0xff]  ;;  %v1618_v4 = vld [vmem:[%s2598_s0 + $0x10] sm:$0xff]  ;;  %v1625_v5 = vld [vmem:[%s2598_s0 + $0x18] sm:$0xff]  ;;  %v1533_v35 = vmov 0  }
   0xe   :  { %v1632_v6 = vld [vmem:[%s2598_s0 + $0x20] sm:$0xff]  ;;  %v1639_v7 = vld [vmem:[%s2598_s0 + $0x28] sm:$0xff]  ;;  %v1646_v8 = vld [vmem:[%s2598_s0 + $0x30] sm:$0xff]  ;;  %1428 = vset.pattern.permute.xlu0 %v1533_v35  ;;  %1429 = vset.pattern.permute.xlu1 %v1533_v35  ;;  %s1338_s23 = sshll.u32 %s2608_s10, 4  ;;  %s1339_s23 = int_to_ptr.hbm [resolvable:$true] %s1338_s23 }
   0xf   :  { %v1653_v9 = vld [vmem:[%s2598_s0 + $0x38] sm:$0xff]  ;;  %v1660_v10 = vld [vmem:[%s2598_s0 + $0x40] sm:$0xff]  ;;  %v1667_v11 = vld [vmem:[%s2598_s0 + $0x48] sm:$0xff]  ;;  %1430 = vset.pattern.permute.xlu2 %v1533_v35 }
  0x10   :  { %v1674_v12 = vld [vmem:[%s2598_s0 + $0x78] sm:$0xff]  ;;  %v1681_v13 = vld [vmem:[%s2598_s0 + $0x50] sm:$0xff]  ;;  %v1695_v15 = vld [vmem:[%s2598_s0 + $0x60] sm:$0xff] }
  0x11   :  { %v1688_v14 = vld [vmem:[%s2598_s0 + $0x58] sm:$0xff]  ;;  %v1702_v16 = vld [vmem:[%s2598_s0 + $0x68] sm:$0xff]  ;;  %v1709_v17 = vld [vmem:[%s2598_s0 + $0x70] sm:$0xff] }
  0x12   :  { %v1743_v29 = vld [vmem:[%s2603_s5] sm:$0x7]  ;;  %v84_v37 = vld [vmem:[%s2600_s2 + $0x10] sm:$0xff]  ;;  %v83_v39 = vld [vmem:[%s2600_s2 + $0x8] sm:$0xff] }
  0x13   :  { %v1748_v31 = vperm.slane %v1743_v29, 0  ;;  %v82_v36 = vld [vmem:[%s2600_s2] sm:$0xff]  ;;  %110 = vperm.xlu1 %1429, %v84_v37   ;;  %v85_v40 = vld [vmem:[%s2600_s2 + $0x18] sm:$0xff]  ;;  %v291_v41 = vld [vmem:[#allocation5 + $0x8] sm:$0xf] }
  0x14   :  { %v305_v2 = vld.sshfl [vmem:[#allocation1] sm:$0xff pattern:$0x75316420]  ;;  %v306_v23 = vld.sshfl [vmem:[#allocation1 + $0x8] sm:$0xff pattern:$0x75316420]  ;;  %100 = vperm.xlu0 %1428, %v82_v36  }
  0x15   :  { %1352 = vmatpush.msk.msra.mxu0 %vm357_vm0, %v305_v2  ;;  %1405 = vmatpush.msk.msra.mxu1 %vm357_vm0, %v305_v2  ;;  %304 = vst [vmem:[#allocation1 + $0x10] ss:$2 sm:$0xff] %v291_v41  ;;  %v179_v43 = vld [vmem:[%s2601_s3 + $0x8] sm:$0xff]  ;;  %v88_v47 = vld [vmem:[%s2600_s2 + $0x30] sm:$0xff]  ;;  %v181_v49 = vld [vmem:[%s2601_s3 + $0x18] sm:$0xff] }
  0x16   :  { %1353 = vmatmul.msk.f32.vlgmr.msra.gmra.mxu0 %vm308_vm1, %v1602_v1  ;;  %1368 = vmatmul.msk.f32.vlgmr.msra.gmra.mxu1 %vm308_vm1, %v1674_v12  ;;  %v87_v44 = vld [vmem:[%s2600_s2 + $0x28] sm:$0xff]  ;;  %v182_v53 = vld [vmem:[%s2601_s3 + $0x20] sm:$0xff]  ;;  %v184_v62 = vld [vmem:[%s2601_s3 + $0x30] sm:$0xff] }
  0x17   :  { %1369 = vmatpush.msk.msrb.mxu1 %vm357_vm0, %v306_v23  ;;  %v90_v55 = vld [vmem:[%s2600_s2 + $0x40] sm:$0xff]  ;;  %v91_v60 = vld [vmem:[%s2600_s2 + $0x48] sm:$0xff]  ;;  %v71_v35 = vld [vmem:[#allocation2 + $0x28] sm:$0xff] }
  0x18   :  { %v86_v59 = vld [vmem:[%s2600_s2 + $0x20] sm:$0xff]  ;;  %v66_v23 = vld [vmem:[#allocation2] sm:$0xff]  ;;  %v72_v37 = vld [vmem:[#allocation2 + $0x30] sm:$0xff] }
  0x19   :  { %120 = vperm.xlu2 %1430, %v86_v59   ;;  %v178_v2 = vld [vmem:[%s2601_s3] sm:$0xff]  ;;  %v95_v36 = vld [vmem:[%s2600_s2 + $0x68] sm:$0xff] }
  0x1b   :  { %115 = vperm.xlu1 %1429, %v85_v40   ;;  %v76_v40 = vld [vmem:[#allocation2 + $0x50] sm:$0xff] }
  0x1c   :  { %105 = vperm.xlu0 %1428, %v83_v39   ;;  %v307_v45 = vld.sshfl [vmem:[#allocation1 + $0x10] sm:$0xff pattern:$0x75316420]  ;;  %v74_v39 = vld [vmem:[#allocation2 + $0x40] sm:$0xff] }
  0x1d   :  { %1386 = vmatpush.msk.msra.mxu2 %vm357_vm0, %v307_v45 }
  0x1e   :  { %1354 = vmatmul.msk.f32.gmra.mxu0 %vm308_vm1, %v1611_v3  ;;  %1370 = vmatmul.msk.f32.vlgmr.msrb.gmra.mxu1 %vm308_vm1, %v1602_v1 }
  0x1f   :  { %1387 = vmatmul.msk.f32.vlgmr.msra.gmra.mxu2 %vm308_vm1, %v1602_v1 }
  0x21   :  { %196 = vperm.xlu2 %1430, %v178_v2  }
  0x23   :  { %125 = vperm.xlu1 %1429, %v87_v44  }
  0x24   :  { %201 = vperm.xlu0 %1428, %v179_v43  }
  0x26   :  { %1355 = vmatmul.msk.f32.gmra.mxu0 %vm308_vm1, %v1618_v4  ;;  %1371 = vmatmul.msk.f32.gmra.mxu1 %vm308_vm1, %v1611_v3 }
  0x27   :  { %1388 = vmatmul.msk.f32.gmra.mxu2 %vm308_vm1, %v1611_v3  ;;  %v185_v3 = vld [vmem:[%s2601_s3 + $0x38] sm:$0xff] }
  0x2b   :  { %211 = vperm.xlu1 %1429, %v181_v49  }
  0x2c   :  { %130 = vperm.xlu0 %1428, %v88_v47   ;;  %v81_v47 = vld [vmem:[#allocation2 + $0x78] sm:$0xff] }
  0x2e   :  { %1356 = vmatmul.msk.f32.gmra.mxu0 %vm308_vm1, %v1625_v5  ;;  %1372 = vmatmul.msk.f32.gmra.mxu1 %vm308_vm1, %v1618_v4 }
  0x2f   :  { %1389 = vmatmul.msk.f32.gmra.mxu2 %vm308_vm1, %v1618_v4 }
  0x33   :  { %140 = vperm.xlu1 %1429, %v90_v55  }
  0x34   :  { %216 = vperm.xlu0 %1428, %v182_v53  }
  0x36   :  { %1357 = vmatmul.msk.f32.gmra.mxu0 %vm308_vm1, %v1632_v6  ;;  %1373 = vmatmul.msk.f32.gmra.mxu1 %vm308_vm1, %v1625_v5 }
  0x37   :  { %1390 = vmatmul.msk.f32.gmra.mxu2 %vm308_vm1, %v1625_v5 }
  0x3b   :  { %226 = vperm.xlu1 %1429, %v184_v62  }
  0x3c   :  { %145 = vperm.xlu0 %1428, %v91_v60  }
  0x3e   :  { %1358 = vmatmul.msk.f32.gmra.mxu0 %vm308_vm1, %v1639_v7  ;;  %1374 = vmatmul.msk.f32.gmra.mxu1 %vm308_vm1, %v1632_v6 }
  0x3f   :  { %1391 = vmatmul.msk.f32.gmra.mxu2 %vm308_vm1, %v1632_v6  ;;  %v89_v6 = vld [vmem:[%s2600_s2 + $0x38] sm:$0xff] }
  0x44   :  { %231 = vperm.xlu0 %1428, %v185_v3  }
  0x46   :  { %1359 = vmatmul.msk.f32.gmra.mxu0 %vm308_vm1, %v1646_v8  ;;  %1375 = vmatmul.msk.f32.gmra.mxu1 %vm308_vm1, %v1639_v7 }
  0x47   :  { %1392 = vmatmul.msk.f32.gmra.mxu2 %vm308_vm1, %v1639_v7  ;;  %v183_v7 = vld [vmem:[%s2601_s3 + $0x28] sm:$0xff] }
  0x4e   :  { %1360 = vmatmul.msk.f32.gmra.mxu0 %vm308_vm1, %v1653_v9  ;;  %1376 = vmatmul.msk.f32.gmra.mxu1 %vm308_vm1, %v1646_v8 }
  0x4f   :  { %1393 = vmatmul.msk.f32.gmra.mxu2 %vm308_vm1, %v1646_v8  ;;  %v92_v8 = vld [vmem:[%s2600_s2 + $0x50] sm:$0xff] }
  0x56   :  { %1361 = vmatmul.msk.f32.gmra.mxu0 %vm308_vm1, %v1660_v10  ;;  %1377 = vmatmul.msk.f32.gmra.mxu1 %vm308_vm1, %v1653_v9 }
  0x57   :  { %1394 = vmatmul.msk.f32.gmra.mxu2 %vm308_vm1, %v1653_v9  ;;  %v186_v9 = vld [vmem:[%s2601_s3 + $0x40] sm:$0xff] }
  0x5e   :  { %1362 = vmatmul.msk.f32.gmra.mxu0 %vm308_vm1, %v1667_v11  ;;  %1378 = vmatmul.msk.f32.gmra.mxu1 %vm308_vm1, %v1660_v10 }
  0x5f   :  { %1395 = vmatmul.msk.f32.gmra.mxu2 %vm308_vm1, %v1660_v10  ;;  %v189_v10 = vld [vmem:[%s2601_s3 + $0x58] sm:$0xff] }
  0x66   :  { %1363 = vmatmul.msk.f32.gmra.mxu0 %vm308_vm1, %v1681_v13  ;;  %1379 = vmatmul.msk.f32.gmra.mxu1 %vm308_vm1, %v1667_v11 }
  0x67   :  { %1396 = vmatmul.msk.f32.gmra.mxu2 %vm308_vm1, %v1667_v11  ;;  %v191_v11 = vld [vmem:[%s2601_s3 + $0x68] sm:$0xff] }
  0x6e   :  { %1364 = vmatmul.msk.f32.gmra.mxu0 %vm308_vm1, %v1688_v14  ;;  %1380 = vmatmul.msk.f32.gmra.mxu1 %vm308_vm1, %v1681_v13 }
  0x6f   :  { %1397 = vmatmul.msk.f32.gmra.mxu2 %vm308_vm1, %v1681_v13  ;;  %v75_v13 = vld [vmem:[#allocation2 + $0x48] sm:$0xff] }
  0x73   :  { %v1949_v60 = vpop.permute.xlu2 %120 }
  0x76   :  { %1365 = vmatmul.msk.f32.gmra.mxu0 %vm308_vm1, %v1695_v15  ;;  %1381 = vmatmul.msk.f32.gmra.mxu1 %vm308_vm1, %v1688_v14 }
  0x77   :  { %1398 = vmatmul.msk.f32.gmra.mxu2 %vm308_vm1, %v1688_v14  ;;  %v77_v14 = vld [vmem:[#allocation2 + $0x58] sm:$0xff] }
  0x7b   :  { %v1961_v2 = vpop.permute.xlu2 %196 }
  0x7e   :  { %1366 = vmatmul.msk.f32.gmra.mxu0 %vm308_vm1, %v1702_v16  ;;  %1382 = vmatmul.msk.f32.gmra.mxu1 %vm308_vm1, %v1695_v15 }
  0x7f   :  { %1399 = vmatmul.msk.f32.gmra.mxu2 %vm308_vm1, %v1695_v15  ;;  %v79_v15 = vld [vmem:[#allocation2 + $0x68] sm:$0xff] }
  0x86   :  { %1367 = vmatmul.msk.f32.gmra.mxu0 %vm308_vm1, %v1709_v17  ;;  %1383 = vmatmul.msk.f32.gmra.mxu1 %vm308_vm1, %v1702_v16 }
  0x87   :  { %1400 = vmatmul.msk.f32.gmra.mxu2 %vm308_vm1, %v1702_v16  ;;  %v80_v16 = vld [vmem:[#allocation2 + $0x70] sm:$0xff] }
  0x8e   :  { %1384 = vmatmul.msk.f32.gmra.mxu1 %vm308_vm1, %v1709_v17 }
  0x8f   :  { %1401 = vmatmul.msk.f32.gmra.mxu2 %vm308_vm1, %v1709_v17 }
  0x93   :  { %v1713_v18 = vpop.f32.mrf.mxu0  ;;  %v426_v30 = vpop.f32.mrf.mxu1 }
  0x94   :  { %v427_v32 = vadd.f32 %v426_v30, %v1748_v31  ;;  %v190_v30 = vld [vmem:[%s2601_s3 + $0x60] sm:$0xff] }
  0x96   :  { %559 = vmatpush.msra.mxu3 %v427_v32  ;;  %1385 = vmatmul.msk.f32.gmra.mxu1 %vm308_vm1, %v1674_v12  ;;  %v192_v32 = vld [vmem:[%s2601_s3 + $0x70] sm:$0xff] }
  0x97   :  { %1402 = vmatmul.msk.f32.gmra.mxu2 %vm308_vm1, %v1674_v12 }
  0x9b   :  { %v1715_v19 = vpop.f32.mrf.mxu0  ;;  %v446_v41 = vpop.f32.mrf.mxu1 }
  0x9c   :  { %v385_v5 = vadd.f32 %v1715_v19, %v1748_v31  ;;  %v94_v19 = vld [vmem:[%s2600_s2 + $0x60] sm:$0xff] }
  0x9d   :  { %160 = vperm.xlu0 %1428, %v94_v19  }
  0xa2   :  { %v1923_v43 = vpop.f32.mrf.mxu2 }
  0xa3   :  { %v1717_v20 = vpop.f32.mrf.mxu0  ;;  %v449_v44 = vpop.f32.mrf.mxu1 }
  0xa4   :  { %v388_v4 = vadd.f32 %v1717_v20, %v1748_v31  ;;  %v180_v20 = vld [vmem:[%s2601_s3 + $0x10] sm:$0xff] }
  0xa5   :  { %206 = vperm.xlu2 %1430, %v180_v20  }
  0xaa   :  { %v1925_v45 = vpop.f32.mrf.mxu2 }
  0xab   :  { %v1719_v21 = vpop.f32.mrf.mxu0 }
  0xac   :  { %v391_v1 = vadd.f32 %v1719_v21, %v1748_v31  ;;  %v93_v21 = vld [vmem:[%s2600_s2 + $0x58] sm:$0xff] }
  0xad   :  { %155 = vperm.xlu1 %1429, %v93_v21   ;;  %135 = vperm.xlu2 %1430, %v89_v6  }
  0xb2   :  { %v1927_v17 = vpop.f32.mrf.mxu2 }
  0xb3   :  { %v1721_v22 = vpop.f32.mrf.mxu0 }
  0xb4   :  { %v394_v0 = vadd.f32 %v1721_v22, %v1748_v31  ;;  %v382_v22 = vadd.f32 %v1713_v18, %v1748_v31  ;;  %v187_v18 = vld [vmem:[%s2601_s3 + $0x48] sm:$0xff] }
  0xb5   :  { %241 = vperm.xlu1 %1429, %v187_v18   ;;  %221 = vperm.xlu2 %1430, %v183_v7  }
  0xba   :  { %v1929_v49 = vpop.f32.mrf.mxu2 }
  0xbb   :  { %v1726_v24 = vpop.f32.mrf.mxu0 }
  0xbc   :  { %v397_v63 = vadd.f32 %v1726_v24, %v1748_v31  ;;  %v67_v24 = vld [vmem:[#allocation2 + $0x8] sm:$0xff] }
  0xbd   :  { %150 = vperm.xlu2 %1430, %v92_v8  }
  0xc3   :  { %v1730_v25 = vpop.f32.mrf.mxu0 }
  0xc4   :  { %v400_v61 = vadd.f32 %v1730_v25, %v1748_v31  ;;  %v188_v25 = vld [vmem:[%s2601_s3 + $0x50] sm:$0xff] }
  0xc5   :  { %246 = vperm.xlu0 %1428, %v188_v25   ;;  %236 = vperm.xlu2 %1430, %v186_v9  }
  0xcb   :  { %v1734_v26 = vpop.f32.mrf.mxu0 }
  0xcc   :  { %v403_v58 = vadd.f32 %v1734_v26, %v1748_v31  ;;  %v96_v26 = vld [vmem:[%s2600_s2 + $0x70] sm:$0xff] }
  0xcd   :  { %170 = vperm.xlu1 %1429, %v96_v26   ;;  %165 = vperm.xlu2 %1430, %v95_v36  }
  0xd3   :  { %v405_v27 = vpop.f32.mrf.mxu0 }
  0xd4   :  { %v406_v57 = vadd.f32 %v405_v27, %v1748_v31  ;;  %v68_v27 = vld [vmem:[#allocation2 + $0x10] sm:$0xff] }
  0xd5   :  { %256 = vperm.xlu1 %1429, %v190_v30   ;;  %251 = vperm.xlu2 %1430, %v189_v10  }
  0xdb   :  { %v408_v28 = vpop.f32.mrf.mxu0 }
  0xdc   :  { %v409_v56 = vadd.f32 %v408_v28, %v1748_v31  ;;  %v97_v28 = vld [vmem:[%s2600_s2 + $0x78] sm:$0xff] }
  0xdd   :  { %175 = vperm.xlu0 %1428, %v97_v28   ;;  %261 = vperm.xlu2 %1430, %v191_v11  }
  0xe3   :  { %v411_v33 = vpop.f32.mrf.mxu0 }
  0xe4   :  { %v412_v54 = vadd.f32 %v411_v33, %v1748_v31  ;;  %v193_v33 = vld [vmem:[%s2601_s3 + $0x78] sm:$0xff] }
  0xe5   :  { %266 = vperm.xlu0 %1428, %v192_v32   ;;  %271 = vperm.xlu1 %1429, %v193_v33  }
  0xeb   :  { %v414_v34 = vpop.f32.mrf.mxu0 }
  0xec   :  { %v415_v52 = vadd.f32 %v414_v34, %v1748_v31  ;;  %v70_v34 = vld [vmem:[#allocation2 + $0x20] sm:$0xff] }
  0xf3   :  { %v417_v38 = vpop.f32.mrf.mxu0 }
  0xf4   :  { %v418_v51 = vadd.f32 %v417_v38, %v1748_v31  ;;  %v73_v38 = vld [vmem:[#allocation2 + $0x38] sm:$0xff] }
  0xfb   :  { %v420_v42 = vpop.f32.mrf.mxu0 }
  0xfc   :  { %v421_v50 = vadd.f32 %v420_v42, %v1748_v31  ;;  %v78_v42 = vld [vmem:[#allocation2 + $0x60] sm:$0xff] }
 0x103   :  { %v423_v46 = vpop.f32.mrf.mxu0 }
 0x104   :  { %v424_v48 = vadd.f32 %v423_v46, %v1748_v31  ;;  %v69_v31 = vld [vmem:[#allocation2 + $0x18] sm:$0xff]  ;;  %v452_v46 = vpop.f32.mrf.mxu1 }
 0x106   :  { %560 = vmatpush.msra.mxu3 %v424_v48 }
 0x108   :  { %561 = vmatpush.msra.mxu3 %v421_v50 }
 0x10a   :  { %562 = vmatpush.msra.mxu3 %v418_v51  ;;  %v1933_v51 = vpop.f32.mrf.mxu2 }
 0x10c   :  { %563 = vmatpush.msra.mxu3 %v415_v52  ;;  %v455_v48 = vpop.f32.mrf.mxu1 }
 0x10e   :  { %564 = vmatpush.msra.mxu3 %v412_v54 }
 0x110   :  { %565 = vmatpush.msra.mxu3 %v409_v56  ;;  %v1941_v56 = vpop.permute.xlu0 %100 }
 0x112   :  { %566 = vmatpush.msra.mxu3 %v406_v57  ;;  %v1939_v55 = vpop.f32.mrf.mxu2 }
 0x114   :  { %567 = vmatpush.msra.mxu3 %v403_v58  ;;  %v458_v50 = vpop.f32.mrf.mxu1  ;;  %v1945_v58 = vpop.permute.xlu1 %110 }
 0x116   :  { %568 = vmatpush.msra.mxu3 %v400_v61 }
 0x118   :  { %569 = vmatpush.msra.mxu3 %v397_v63  ;;  %v1953_v62 = vpop.permute.xlu0 %105 }
 0x119   :  { %2619 = vst [vmem:[#allocation11_spill] sm:$0xff] %v1953_v62 }
 0x11a   :  { %570 = vmatpush.msra.mxu3 %v394_v0  ;;  %v1951_v61 = vpop.f32.mrf.mxu2 }
 0x11c   :  { %571 = vmatpush.msra.mxu3 %v391_v1  ;;  %v461_v53 = vpop.f32.mrf.mxu1  ;;  %v1959_v1 = vpop.permute.xlu1 %115 }
 0x11d   :  { %2620 = vst [vmem:[#allocation12_spill] sm:$0xff] %v1959_v1 }
 0x11e   :  { %572 = vmatpush.msra.mxu3 %v388_v4 }
 0x120   :  { %573 = vmatpush.msra.mxu3 %v385_v5  ;;  %v1965_v4 = vpop.permute.xlu0 %201 }
 0x122   :  { %574 = vmatpush.msra.mxu3 %v382_v22  ;;  %v1963_v3 = vpop.f32.mrf.mxu2 }
 0x123   :  { %575 = vmatmul.f32.vlgmr.msra.gmra.mxu3 %v66_v23  ;;  %v1971_v23 = vpop.permute.xlu2 %206 }
 0x124   :  { %v1943_v57 = vpop.f32.mrf.mxu1  ;;  %v1969_v22 = vpop.permute.xlu1 %125  ;;  %2621 = vst [vmem:[#allocation13_spill] sm:$0xff] %v1971_v23 }
 0x128   :  { %v1975_v19 = vpop.permute.xlu0 %130 }
 0x12a   :  { %v1973_v20 = vpop.f32.mrf.mxu2 }
 0x12b   :  { %578 = vmatmul.f32.gmra.mxu3 %v67_v24  ;;  %v1981_v25 = vpop.permute.xlu2 %135 }
 0x12c   :  { %v1955_v63 = vpop.f32.mrf.mxu1  ;;  %v1979_v6 = vpop.permute.xlu1 %211  ;;  %2623 = vst [vmem:[#allocation15_spill] sm:$0xff] %v1981_v25 }
 0x12d   :  { %2622 = vst [vmem:[#allocation14_spill] sm:$0xff] %v1979_v6 }
 0x130   :  { %v1987_v7 = vpop.permute.xlu0 %216 }
 0x131   :  { %2624 = vst [vmem:[#allocation16_spill] sm:$0xff] %v1987_v7 }
 0x133   :  { %581 = vmatmul.f32.gmra.mxu3 %v68_v27  ;;  %v1985_v27 = vpop.f32.mrf.mxu2  ;;  %v1995_v8 = vpop.permute.xlu2 %221 }
 0x134   :  { %v470_v5 = vpop.f32.mrf.mxu1  ;;  %v1991_v30 = vpop.permute.xlu1 %140 }
 0x135   :  { %2625 = vst [vmem:[#allocation17_spill] sm:$0xff] %v1991_v30 }
 0x138   :  { %v1999_v33 = vpop.permute.xlu0 %145 }
 0x139   :  { %2626 = vst [vmem:[#allocation18_spill] sm:$0xff] %v1999_v33 }
 0x13b   :  { %584 = vmatmul.f32.gmra.mxu3 %v69_v31  ;;  %v1997_v32 = vpop.f32.mrf.mxu2  ;;  %v2011_v10 = vpop.permute.xlu2 %150 }
 0x13c   :  { %v473_v24 = vpop.f32.mrf.mxu1  ;;  %v2008_v36 = vpop.permute.xlu1 %226 }
 0x143   :  { %587 = vmatmul.f32.gmra.mxu3 %v70_v34 }
 0x144   :  { %v1989_v28 = vpop.f32.mrf.mxu1 }
 0x14b   :  { %590 = vmatmul.f32.gmra.mxu3 %v71_v35  ;;  %v2006_v35 = vperm.slane %v1743_v29, 1 }
 0x14c   :  { %v2001_v34 = vpop.f32.mrf.mxu1 }
 0x14d   :  { %v447_v11 = vadd.f32 %v446_v41, %v2006_v35 }
 0x153   :  { %593 = vmatmul.f32.gmra.mxu3 %v72_v37  ;;  %v450_v37 = vadd.f32 %v449_v44, %v2006_v35  ;;  %v624_v44 = vmul.f32 %v447_v11, %v1941_v56 }
 0x154   :  { %v482_v41 = vpop.f32.mrf.mxu1 }
 0x15b   :  { %596 = vmatmul.f32.gmra.mxu3 %v73_v38  ;;  %v2013_v38 = vpop.f32.mrf.mxu2 }
 0x15c   :  { %2627 = vst [vmem:[#allocation19_spill] sm:$0xff] %v2013_v38 }
 0x163   :  { %599 = vmatmul.f32.gmra.mxu3 %v74_v39  ;;  %v453_v39 = vadd.f32 %v452_v46, %v2006_v35 }
 0x16b   :  { %602 = vmatmul.f32.gmra.mxu3 %v75_v13  ;;  %v2017_v13 = vpop.permute.xlu0 %231 }
 0x173   :  { %605 = vmatmul.f32.gmra.mxu3 %v76_v40  ;;  %v456_v40 = vadd.f32 %v455_v48, %v2006_v35 }
 0x175   :  { %v627_v46 = vmul.f32 %v456_v40, %v1959_v1  ;;  %v2043_v1 = vpop.permute.xlu2 %236 }
 0x17b   :  { %608 = vmatmul.f32.gmra.mxu3 %v77_v14  ;;  %v625_v14 = vmul.f32 %v450_v37, %v1953_v62  ;;  %v462_v37 = vadd.f32 %v461_v53, %v2006_v35  ;;  %v2035_v62 = vpop.permute.xlu1 %155 }
 0x183   :  { %611 = vmatmul.f32.gmra.mxu3 %v78_v42  ;;  %v459_v42 = vadd.f32 %v458_v50, %v2006_v35 }
 0x185   :  { %v628_v50 = vmul.f32 %v459_v42, %v1949_v60  ;;  %v2055_v42 = vpop.permute.xlu0 %160 }
 0x18b   :  { %614 = vmatmul.f32.gmra.mxu3 %v79_v15 }
 0x193   :  { %617 = vmatmul.f32.gmra.mxu3 %v80_v16  ;;  %v626_v16 = vmul.f32 %v453_v39, %v1945_v58 }
 0x19b   :  { %620 = vmatmul.f32.gmra.mxu3 %v81_v47  ;;  %v2027_v47 = vperm.slane %v1743_v29, 2 }
 0x19d   :  { %v515_v38 = vadd.f32 %v1925_v45, %v2027_v47  ;;  %v512_v11 = vadd.f32 %v1923_v43, %v2027_v47  ;;  %v518_v39 = vadd.f32 %v1927_v17, %v2027_v47  ;;  %v2045_v45 = vpop.f32.mrf.mxu2  ;;  %v521_v53 = vadd.f32 %v1929_v49, %v2027_v47 }
 0x19e   :  { %v465_v43 = vadd.f32 %v1943_v57, %v2006_v35  ;;  %v471_v57 = vadd.f32 %v470_v5, %v2006_v35 }
 0x1a6   :  { %v1931_v12 = vpop.f32.mrf.mxu3 }
 0x1a7   :  { %v640_v29 = vsub.f32 %v1931_v12, %v624_v44  ;;  %v629_v12 = vmul.f32 %v462_v37, %v1969_v22  ;;  %v630_v37 = vmul.f32 %v465_v43, %v1975_v19  ;;  %v2096_v43 = vpop.permute.xlu2 %165 }
 0x1ae   :  { %v1935_v52 = vpop.f32.mrf.mxu3 }
 0x1af   :  { %v641_v48 = vsub.f32 %v1935_v52, %v625_v14 }
 0x1b1   :  { %v2047_v52 = vadd.f32 %v641_v48, %v515_v38  ;;  %v524_v38 = vadd.f32 %v1933_v51, %v2027_v47  ;;  %v527_v51 = vadd.f32 %v1939_v55, %v2027_v47  ;;  %v632_v55 = vmul.f32 %v471_v57, %v1991_v30 }
 0x1b2   :  { %v480_v57 = vadd.f32 %v2001_v34, %v2006_v35 }
 0x1b6   :  { %v1937_v54 = vpop.f32.mrf.mxu3 }
 0x1b7   :  { %v642_v40 = vsub.f32 %v1937_v54, %v626_v16  ;;  %v2059_v54 = vadd.f32 %v640_v29, %v512_v11  ;;  %v673_v16 = vmul.f32 %v2047_v52, %v1965_v4  ;;  %v474_v11 = vadd.f32 %v473_v24, %v2006_v35 }
 0x1b8   :  { %v530_v24 = vadd.f32 %v1951_v61, %v2027_v47  ;;  %v533_v61 = vadd.f32 %v1963_v3, %v2027_v47 }
 0x1b9   :  { %v2061_v44 = vadd.f32 %v642_v40, %v518_v39  ;;  %v2085_v39 = vpop.permute.xlu1 %241 }
 0x1bb   :  { %v674_v5 = vmul.f32 %v2061_v44, %v1971_v23 }
 0x1be   :  { %v1947_v59 = vpop.f32.mrf.mxu3 }
 0x1bf   :  { %v643_v14 = vsub.f32 %v1947_v59, %v627_v46  ;;  %v468_v59 = vadd.f32 %v1955_v63, %v2006_v35  ;;  %v485_v46 = vpop.f32.mrf.mxu1  ;;  %v672_v63 = vmul.f32 %v2059_v54, %v1961_v2 }
 0x1c1   :  { %v2071_v48 = vadd.f32 %v643_v14, %v521_v53  ;;  %v631_v29 = vmul.f32 %v468_v59, %v1981_v25  ;;  %v710_v53 = vmul.f32 %v673_v16, %v2047_v52  ;;  %v550_v59 = vpop.f32.mrf.mxu2 }
 0x1c3   :  { %v675_v14 = vmul.f32 %v2071_v48, %v1979_v6 }
 0x1c5   :  { %v712_v30 = vmul.f32 %v675_v14, %v2071_v48 }
 0x1c6   :  { %v1957_v0 = vpop.f32.mrf.mxu3 }
 0x1c7   :  { %v644_v49 = vsub.f32 %v1957_v0, %v628_v50  ;;  %v488_v25 = vpop.f32.mrf.mxu1 }
 0x1c9   :  { %v2082_v50 = vadd.f32 %v644_v49, %v524_v38 }
 0x1ce   :  { %v1967_v21 = vpop.f32.mrf.mxu3 }
 0x1cf   :  { %v645_v0 = vsub.f32 %v1967_v21, %v629_v12  ;;  %v477_v21 = vadd.f32 %v1989_v28, %v2006_v35  ;;  %v633_v12 = vmul.f32 %v474_v11, %v1999_v33  ;;  %v709_v28 = vmul.f32 %v672_v63, %v2059_v54 }
 0x1d0   :  { %v676_v11 = vmul.f32 %v2082_v50, %v1987_v7  ;;  %v688_v33 = vadd.f32 %v673_v16, %v672_v63 }
 0x1d1   :  { %v2099_v38 = vadd.f32 %v645_v0, %v527_v51  ;;  %v483_v51 = vadd.f32 %v482_v41, %v2006_v35  ;;  %v2113_v0 = vpop.permute.xlu0 %246  ;;  %v725_v6 = vadd.f32 %v710_v53, %v709_v28  ;;  %v634_v34 = vmul.f32 %v477_v21, %v2011_v10 }
 0x1d2   :  { %v539_v41 = vadd.f32 %v1985_v27, %v2027_v47  ;;  %v635_v53 = vmul.f32 %v480_v57, %v2035_v62  ;;  %v2628_v57 = vld [vmem:[#allocation19_spill] sm:$0xff] }
 0x1d3   :  { %v677_v7 = vmul.f32 %v2099_v38, %v1995_v8  ;;  %v636_v27 = vmul.f32 %v483_v51, %v2055_v42 }
 0x1d6   :  { %v1977_v18 = vpop.f32.mrf.mxu3 }
 0x1d7   :  { %v646_v40 = vsub.f32 %v1977_v18, %v630_v37  ;;  %v711_v37 = vmul.f32 %v674_v5, %v2061_v44 }
 0x1d9   :  { %v2115_v3 = vadd.f32 %v646_v40, %v530_v24  ;;  %v689_v40 = vadd.f32 %v688_v33, %v674_v5  ;;  %v486_v33 = vadd.f32 %v485_v46, %v2006_v35  ;;  %v2140_v5 = vpop.permute.xlu1 %170 }
 0x1db   :  { %v678_v16 = vmul.f32 %v2115_v3, %v2008_v36 }
 0x1dd   :  { %v715_v51 = vmul.f32 %v678_v16, %v2115_v3 }
 0x1de   :  { %v1983_v26 = vpop.f32.mrf.mxu3 }
 0x1df   :  { %v647_v18 = vsub.f32 %v1983_v26, %v631_v29  ;;  %v536_v26 = vadd.f32 %v1973_v20, %v2027_v47  ;;  %v726_v20 = vadd.f32 %v725_v6, %v711_v37  ;;  %v690_v6 = vadd.f32 %v689_v40, %v675_v14 }
 0x1e0   :  { %v545_v37 = vadd.f32 %v2628_v57, %v2027_v47 }
 0x1e1   :  { %v2124_v23 = vadd.f32 %v647_v18, %v533_v61  ;;  %v691_v28 = vadd.f32 %v690_v6, %v676_v11 }
 0x1e3   :  { %v679_v61 = vmul.f32 %v2124_v23, %v2017_v13 }
 0x1e6   :  { %v1993_v31 = vpop.f32.mrf.mxu3 }
 0x1e7   :  { %v648_v29 = vsub.f32 %v1993_v31, %v632_v55  ;;  %v713_v31 = vmul.f32 %v676_v11, %v2082_v50  ;;  %v542_v55 = vadd.f32 %v1997_v32, %v2027_v47  ;;  %v548_v11 = vadd.f32 %v2045_v45, %v2027_v47 }
 0x1e9   :  { %v2132_v63 = vadd.f32 %v648_v29, %v536_v26 }
 0x1eb   :  { %v680_v26 = vmul.f32 %v2132_v63, %v2043_v1 }
 0x1ed   :  { %v717_v6 = vmul.f32 %v680_v26, %v2132_v63 }
 0x1ee   :  { %v2003_v9 = vpop.f32.mrf.mxu3 }
 0x1ef   :  { %v649_v24 = vsub.f32 %v2003_v9, %v633_v12  ;;  %v727_v9 = vadd.f32 %v726_v20, %v712_v30  ;;  %v714_v12 = vmul.f32 %v677_v7, %v2099_v38  ;;  %v2151_v30 = vpop.permute.xlu2 %251  ;;  %v716_v20 = vmul.f32 %v679_v61, %v2124_v23 }
 0x1f1   :  { %v2145_v18 = vadd.f32 %v649_v24, %v539_v41  ;;  %v728_v14 = vadd.f32 %v727_v9, %v713_v31  ;;  %v637_v41 = vmul.f32 %v486_v33, %v2096_v43 }
 0x1f3   :  { %v729_v40 = vadd.f32 %v728_v14, %v714_v12  ;;  %v681_v31 = vmul.f32 %v2145_v18, %v2085_v39 }
 0x1f5   :  { %v718_v57 = vmul.f32 %v681_v31, %v2145_v18 }
 0x1f6   :  { %v2022_v15 = vpop.f32.mrf.mxu3 }
 0x1f7   :  { %v650_v21 = vsub.f32 %v2022_v15, %v634_v34  ;;  %v489_v15 = vadd.f32 %v488_v25, %v2006_v35  ;;  %v553_v34 = vpop.f32.mrf.mxu2  ;;  %v692_v25 = vadd.f32 %v691_v28, %v677_v7  ;;  %v730_v7 = vadd.f32 %v729_v40, %v715_v51  ;;  %v2182_v51 = vpop.permute.xlu1 %256 }
 0x1f8   :  { %v554_v12 = vadd.f32 %v553_v34, %v2027_v47  ;;  %v2199_v40 = vpop.permute.xlu2 %261 }
 0x1f9   :  { %v2156_v29 = vadd.f32 %v650_v21, %v542_v55  ;;  %v551_v21 = vadd.f32 %v550_v59, %v2027_v47  ;;  %v638_v28 = vmul.f32 %v489_v15, %v2140_v5 }
 0x1fb   :  { %v682_v45 = vmul.f32 %v2156_v29, %v2113_v0 }
 0x1fd   :  { %v719_v34 = vmul.f32 %v682_v45, %v2156_v29 }
 0x1fe   :  { %v2057_v17 = vpop.f32.mrf.mxu3 }
 0x1ff   :  { %v651_v46 = vsub.f32 %v2057_v17, %v635_v53  ;;  %v2162_v17 = vpop.permute.xlu0 %175  ;;  %v693_v53 = vadd.f32 %v692_v25, %v678_v16  ;;  %v731_v16 = vadd.f32 %v730_v7, %v716_v20  ;;  %v861_v7 = vld [vmem:[%s2604_s6 + $0x150] sm:$0xff] }
 0x201   :  { %v2167_v55 = vadd.f32 %v651_v46, %v545_v37 }
 0x206   :  { %v2104_v49 = vpop.f32.mrf.mxu3 }
 0x207   :  { %v652_v24 = vsub.f32 %v2104_v49, %v636_v27  ;;  %v491_v49 = vpop.f32.mrf.mxu1  ;;  %v694_v27 = vadd.f32 %v693_v53, %v679_v61 }
 0x208   :  { %v492_v61 = vadd.f32 %v491_v49, %v2006_v35  ;;  %v866_v35 = vld [vmem:[%s2604_s6 + $0x178] sm:$0xff]  ;;  %v863_v49 = vld [vmem:[%s2604_s6 + $0x160] sm:$0xff] }
 0x209   :  { %v2173_v9 = vadd.f32 %v652_v24, %v548_v11  ;;  %v695_v59 = vadd.f32 %v694_v27, %v680_v26  ;;  %v864_v26 = vld [vmem:[%s2604_s6 + $0x168] sm:$0xff]  ;;  %v865_v24 = vld [vmem:[%s2604_s6 + $0x170] sm:$0xff]  ;;  %1005 = vmatpush.msrb.mxu2 %v866_v35  ;;  %v2213_v27 = vpop.permute.xlu0 %266 }
 0x20a   :  { %875 = vmatpush.msrb.mxu0 %v864_v26  ;;  %940 = vmatpush.msra.mxu1 %v865_v24  ;;  %v855_v26 = vld [vmem:[%s2604_s6 + $0x120] sm:$0xff]  ;;  %v856_v24 = vld [vmem:[%s2604_s6 + $0x128] sm:$0xff]  ;;  %v857_v35 = vld [vmem:[%s2604_s6 + $0x130] sm:$0xff] }
 0x20b   :  { %v696_v25 = vadd.f32 %v695_v59, %v681_v31  ;;  %v684_v15 = vmul.f32 %v2173_v9, %v2182_v51  ;;  %v556_v31 = vpop.f32.mrf.mxu2  ;;  %1006 = vmatpush.msrb.mxu2 %v863_v49  ;;  %v858_v59 = vld [vmem:[%s2604_s6 + $0x138] sm:$0xff]  ;;  %v2251_v49 = vpop.permute.xlu1 %271 }
 0x20c   :  { %876 = vmatpush.msrb.mxu0 %v861_v7  ;;  %v853_v7 = vld [vmem:[%s2604_s6 + $0x110] sm:$0xff] }
 0x20d   :  { %v697_v53 = vadd.f32 %v696_v25, %v682_v45 }
 0x20e   :  { %v615_v32 = vpop.f32.mrf.mxu3  ;;  %877 = vmatpush.msrb.mxu0 %v858_v59 }
 0x20f   :  { %v653_v33 = vsub.f32 %v615_v32, %v637_v41  ;;  %v683_v32 = vmul.f32 %v2167_v55, %v2151_v30  ;;  %v732_v41 = vadd.f32 %v731_v16, %v717_v6  ;;  %v862_v6 = vld [vmem:[%s2604_s6 + $0x158] sm:$0xff]  ;;  %v721_v16 = vmul.f32 %v684_v15, %v2173_v9 }
 0x210   :  { %941 = vmatpush.msra.mxu1 %v862_v6  ;;  %878 = vmatpush.msrb.mxu0 %v855_v26  ;;  %v854_v6 = vld [vmem:[%s2604_s6 + $0x118] sm:$0xff]  ;;  %v844_v26 = vld [vmem:[%s2604_s6 + $0xc8] sm:$0xff] }
 0x211   :  { %v2180_v46 = vadd.f32 %v653_v33, %v551_v21  ;;  %v733_v20 = vadd.f32 %v732_v41, %v718_v57  ;;  %v720_v21 = vmul.f32 %v683_v32, %v2167_v55 }
 0x213   :  { %v685_v33 = vmul.f32 %v2180_v46, %v2199_v40  ;;  %v734_v45 = vadd.f32 %v733_v20, %v719_v34 }
 0x215   :  { %v735_v41 = vadd.f32 %v734_v45, %v720_v21  ;;  %v852_v21 = vld [vmem:[%s2604_s6 + $0x108] sm:$0xff] }
 0x216   :  { %v618_v37 = vpop.f32.mrf.mxu3  ;;  %879 = vmatpush.msrb.mxu0 %v852_v21  ;;  %v842_v21 = vld [vmem:[%s2604_s6 + $0xb8] sm:$0xff] }
 0x217   :  { %v654_v14 = vsub.f32 %v618_v37, %v638_v28  ;;  %v698_v28 = vadd.f32 %v697_v53, %v683_v32  ;;  %v557_v37 = vadd.f32 %v556_v31, %v2027_v47  ;;  %v860_v32 = vld [vmem:[%s2604_s6 + $0x148] sm:$0xff]  ;;  %v722_v47 = vmul.f32 %v685_v33, %v2180_v46 }
 0x218   :  { %1007 = vmatpush.msrb.mxu2 %v860_v32  ;;  %v736_v20 = vadd.f32 %v735_v41, %v721_v16  ;;  %v850_v16 = vld [vmem:[%s2604_s6 + $0xf8] sm:$0xff]  ;;  %v848_v41 = vld [vmem:[%s2604_s6 + $0xe8] sm:$0xff] }
 0x219   :  { %v2188_v11 = vadd.f32 %v654_v14, %v554_v12  ;;  %v639_v12 = vmul.f32 %v492_v61, %v2162_v17  ;;  %v859_v14 = vld [vmem:[%s2604_s6 + $0x140] sm:$0xff]  ;;  %v699_v34 = vadd.f32 %v698_v28, %v684_v15  ;;  %v849_v28 = vld [vmem:[%s2604_s6 + $0xf0] sm:$0xff]  ;;  %v846_v32 = vld [vmem:[%s2604_s6 + $0xd8] sm:$0xff] }
 0x21a   :  { %942 = vmatpush.msra.mxu1 %v859_v14  ;;  %1008 = vmatpush.msrb.mxu2 %v857_v35 }
 0x21b   :  { %v686_v57 = vmul.f32 %v2188_v11, %v2213_v27  ;;  %v700_v15 = vadd.f32 %v699_v34, %v685_v33  ;;  %v737_v33 = vadd.f32 %v736_v20, %v722_v47  ;;  %880 = vmatpush.msrb.mxu0 %v849_v28 }
 0x21c   :  { %943 = vmatpush.msra.mxu1 %v856_v24  ;;  %1009 = vmatpush.msrb.mxu2 %v854_v6  ;;  %v845_v24 = vld [vmem:[%s2604_s6 + $0xd0] sm:$0xff] }
 0x21d   :  { %v723_v31 = vmul.f32 %v686_v57, %v2188_v11  ;;  %v701_v45 = vadd.f32 %v700_v15, %v686_v57  ;;  %881 = vmatpush.msrb.mxu0 %v846_v32  ;;  %v840_v15 = vld [vmem:[%s2604_s6 + $0xa8] sm:$0xff] }
 0x21e   :  { %v621_v61 = vpop.f32.mrf.mxu3  ;;  %944 = vmatpush.msra.mxu1 %v853_v7 }
 0x21f   :  { %v655_v25 = vsub.f32 %v621_v61, %v639_v12  ;;  %v738_v59 = vadd.f32 %v737_v33, %v723_v31  ;;  %v847_v61 = vld [vmem:[%s2604_s6 + $0xe0] sm:$0xff]  ;;  %v841_v31 = vld [vmem:[%s2604_s6 + $0xb0] sm:$0xff] }
 0x220   :  { %945 = vmatpush.msra.mxu1 %v850_v16  ;;  %v837_v33 = vld [vmem:[%s2604_s6 + $0x90] sm:$0xff] }
 0x221   :  { %v2240_v53 = vadd.f32 %v655_v25, %v557_v37  ;;  %v851_v37 = vld [vmem:[%s2604_s6 + $0x100] sm:$0xff] }
 0x222   :  { %1010 = vmatpush.msrb.mxu2 %v851_v37  ;;  %946 = vmatpush.msra.mxu1 %v847_v61  ;;  %v843_v25 = vld [vmem:[%s2604_s6 + $0xc0] sm:$0xff]  ;;  %v834_v37 = vld [vmem:[%s2604_s6 + $0x78] sm:$0xff] }
 0x223   :  { %v687_v12 = vmul.f32 %v2240_v53, %v2251_v49  ;;  %882 = vmatpush.msrb.mxu0 %v843_v25  ;;  %v831_v61 = vld [vmem:[%s2604_s6 + $0x60] sm:$0xff] }
 0x224   :  { %1011 = vmatpush.msrb.mxu2 %v848_v41  ;;  %947 = vmatpush.msra.mxu1 %v844_v26  ;;  %v832_v41 = vld [vmem:[%s2604_s6 + $0x68] sm:$0xff] }
 0x225   :  { %v702_v57 = vadd.f32 %v701_v45, %v687_v12  ;;  %v724_v14 = vmul.f32 %v687_v12, %v2240_v53  ;;  %883 = vmatpush.msrb.mxu0 %v840_v15  ;;  %v838_v45 = vld [vmem:[%s2604_s6 + $0x98] sm:$0xff]  ;;  %v839_v12 = vld [vmem:[%s2604_s6 + $0xa0] sm:$0xff]  ;;  %v828_v26 = vld [vmem:[%s2604_s6 + $0x48] sm:$0xff] }
 0x226   :  { %1012 = vmatpush.msrb.mxu2 %v845_v24  ;;  %948 = vmatpush.msra.mxu1 %v841_v31  ;;  %v829_v24 = vld [vmem:[%s2604_s6 + $0x50] sm:$0xff] }
 0x227   :  { %v703_v34 = vrot.slane %v702_v57, 4  ;;  %v739_v47 = vadd.f32 %v738_v59, %v724_v14  ;;  %884 = vmatpush.msrb.mxu0 %v837_v33  ;;  %v835_v59 = vld [vmem:[%s2604_s6 + $0x80] sm:$0xff]  ;;  %v825_v31 = vld [vmem:[%s2604_s6 + $0x30] sm:$0xff] }
 0x228   :  { %1013 = vmatpush.msrb.mxu2 %v842_v21  ;;  %949 = vmatpush.msra.mxu1 %v838_v45  ;;  %v826_v21 = vld [vmem:[%s2604_s6 + $0x38] sm:$0xff]  ;;  %v823_v33 = vld [vmem:[%s2604_s6 + $0x20] sm:$0xff]  ;;  %v824_v45 = vld [vmem:[%s2604_s6 + $0x28] sm:$0xff] }
 0x229   :  { %v704_v35 = vadd.f32 %v703_v34, %v702_v57  ;;  %v740_v20 = vrot.slane %v739_v47, 4  ;;  %885 = vmatpush.msrb.mxu0 %v834_v37  ;;  %v836_v57 = vld [vmem:[%s2604_s6 + $0x88] sm:$0xff]  ;;  %v833_v34 = vld [vmem:[%s2604_s6 + $0x70] sm:$0xff] }
 0x22a   :  { %1014 = vmatpush.msrb.mxu2 %v839_v12  ;;  %950 = vmatpush.msra.mxu1 %v835_v59  ;;  %v821_v37 = vld [vmem:[%s2604_s6 + $0x10] sm:$0xff] }
 0x22b   :  { %v705_v7 = vrot.slane %v704_v35, 2  ;;  %v741_v6 = vadd.f32 %v740_v20, %v739_v47  ;;  %886 = vmatpush.msrb.mxu0 %v831_v61 }
 0x22c   :  { %1015 = vmatpush.msrb.mxu2 %v836_v57  ;;  %951 = vmatpush.msra.mxu1 %v832_v41 }
 0x22d   :  { %v706_v28 = vadd.f32 %v705_v7, %v704_v35  ;;  %v742_v16 = vrot.slane %v741_v6, 2  ;;  %v830_v35 = vld [vmem:[%s2604_s6 + $0x58] sm:$0xff]  ;;  %887 = vmatpush.msrb.mxu0 %v828_v26  ;;  %v827_v7 = vld [vmem:[%s2604_s6 + $0x40] sm:$0xff] }
 0x22e   :  { %1016 = vmatpush.msrb.mxu2 %v833_v34  ;;  %952 = vmatpush.msra.mxu1 %v829_v24 }
 0x22f   :  { %v707_v14 = vrot.slane %v706_v28, 1  ;;  %v743_v32 = vadd.f32 %v742_v16, %v741_v6  ;;  %888 = vmatpush.msrb.mxu0 %v825_v31  ;;  %v822_v6 = vld [vmem:[%s2604_s6 + $0x18] sm:$0xff]  ;;  %v820_v16 = vld [vmem:[%s2604_s6 + $0x8] sm:$0xff] }
 0x230   :  { %1017 = vmatpush.msrb.mxu2 %v830_v35  ;;  %953 = vmatpush.msra.mxu1 %v826_v21 }
 0x231   :  { %v708_v47 = vadd.f32 %v707_v14, %v706_v28  ;;  %v744_v25 = vrot.slane %v743_v32, 1  ;;  %v819_v28 = vld [vmem:[%s2604_s6] sm:$0xff]  ;;  %889 = vmatpush.msrb.mxu0 %v822_v6 }
 0x232   :  { %1018 = vmatpush.msrb.mxu2 %v827_v7  ;;  %954 = vmatpush.msra.mxu1 %v823_v33 }
 0x233   :  { %v745_v20 = vadd.f32 %v744_v25, %v743_v32  ;;  %v746_v15 = vmul.f32 %v708_v47, %v708_v47  ;;  %890 = vmatpush.msrb.mxu0 %v819_v28  ;;  %v749_v25 = vld [vmem:[%s2606_s8] sm:$0x1] }
 0x234   :  { %1019 = vmatpush.msrb.mxu2 %v824_v45  ;;  %955 = vmatpush.msra.mxu1 %v820_v16 }
 0x235   :  { %v747_v12 = vsub.f32 %v745_v20, %v746_v15  ;;  %v762_v20 = vld [vmem:[%s2607_s9] sm:$0x1] }
 0x236   :  { %1020 = vmatpush.msrb.mxu2 %v821_v37 }
 0x237   :  { %v748_v59 = vmax.f32 %v747_v12, 0.0 }
 0x239   :  { %v750_v57 = vadd.f32 1e-05, %v748_v59 }
 0x23b   :  { %1431 = vrsqrt.f32 %v750_v57  ;;  %vm757_vm3 = vweird.f32 %v750_v57 }
 0x241   :  { %v1432_v14 = vpop.eup %1431 }
 0x242   :  { %v752_v32 = vmul.f32 %v1432_v14, %v750_v57  ;;  %vm758_vm2 = vweird.f32 %v1432_v14 }
 0x243   :  { %vm759_vm4 = vmor %vm757_vm3, %vm758_vm2 }
 0x244   :  { %v753_v61 = vmul.f32 %v1432_v14, %v752_v32 }
 0x246   :  { %v754_v41 = vmul.f32 0.5, %v753_v61 }
 0x248   :  { %v755_v34 = vsub.f32 1.5, %v754_v41 }
 0x24a   :  { %v756_v26 = vmul.f32 %v1432_v14, %v755_v34 }
 0x24c   :  { %v760_v24 = vsel %vm759_vm4, %v1432_v14, %v756_v26 }
 0x24d   :  { %v761_v35 = vmul.f32 %v760_v24, %v749_v25 }
 0x24f   :  { %v763_v15 = vmul.f32 %v761_v35, %v708_v47  ;;  %v766_v31 = vperm.slane %v761_v35, 0 }
 0x251   :  { %v764_v21 = vsub.f32 %v762_v20, %v763_v15  ;;  %v768_v6 = vmul.f32 %v766_v31, %v2059_v54  ;;  %v776_v12 = vmul.f32 %v766_v31, %v2132_v63  ;;  %v777_v28 = vmul.f32 %v766_v31, %v2145_v18 }
 0x252   :  { %v778_v16 = vmul.f32 %v766_v31, %v2156_v29  ;;  %v769_v37 = vmul.f32 %v766_v31, %v2047_v52  ;;  %v779_v59 = vmul.f32 %v766_v31, %v2167_v55  ;;  %v780_v57 = vmul.f32 %v766_v31, %v2173_v9 }
 0x253   :  { %v785_v7 = vperm.slane %v764_v21, 0  ;;  %v781_v47 = vmul.f32 %v766_v31, %v2180_v46  ;;  %v782_v18 = vmul.f32 %v766_v31, %v2188_v11  ;;  %v783_v52 = vmul.f32 %v766_v31, %v2240_v53 }
 0x254   :  { %v770_v34 = vmul.f32 %v766_v31, %v2061_v44  ;;  %v771_v24 = vmul.f32 %v766_v31, %v2071_v48  ;;  %v772_v53 = vmul.f32 %v766_v31, %v2082_v50  ;;  %v773_v44 = vmul.f32 %v766_v31, %v2099_v38 }
 0x255   :  { %v787_v33 = vadd.f32 %v785_v7, %v768_v6  ;;  %v795_v14 = vadd.f32 %v785_v7, %v776_v12  ;;  %v796_v54 = vadd.f32 %v785_v7, %v777_v28  ;;  %v797_v32 = vadd.f32 %v785_v7, %v778_v16 }
 0x256   :  { %v798_v61 = vadd.f32 %v785_v7, %v779_v59  ;;  %v799_v63 = vadd.f32 %v785_v7, %v780_v57  ;;  %v2369_v41 = vadd.f32 %v785_v7, %v781_v47  ;;  %v788_v29 = vadd.f32 %v785_v7, %v769_v37  ;;  %v867_v57 = vld [vmem:[%s2605_s7] sm:$0x7] }
 0x257   :  { %v803_v45 = vmax.f32 %v787_v33, 0.0  ;;  %v2373_v55 = vadd.f32 %v785_v7, %v782_v18  ;;  %v2375_v9 = vadd.f32 %v785_v7, %v783_v52  ;;  %v789_v25 = vadd.f32 %v785_v7, %v770_v34 }
 0x258   :  { %v804_v46 = vmax.f32 %v788_v29, 0.0  ;;  %v790_v11 = vadd.f32 %v785_v7, %v771_v24  ;;  %v791_v20 = vadd.f32 %v785_v7, %v772_v53  ;;  %v792_v21 = vadd.f32 %v785_v7, %v773_v44 }
 0x259   :  { %891 = vmatmul.f32.vlgmr.msrb.gmra.mxu0 %v803_v45  ;;  %956 = vmatmul.f32.vlgmr.msra.gmra.mxu1 %v803_v45  ;;  %v805_v26 = vmax.f32 %v789_v25, 0.0  ;;  %v774_v48 = vmul.f32 %v766_v31, %v2115_v3  ;;  %v775_v50 = vmul.f32 %v766_v31, %v2124_v23  ;;  %v811_v38 = vmax.f32 %v795_v14, 0.0 }
 0x25a   :  { %1021 = vmatmul.f32.vlgmr.msrb.gmra.mxu2 %v803_v45  ;;  %v806_v35 = vmax.f32 %v790_v11, 0.0  ;;  %v807_v15 = vmax.f32 %v791_v20, 0.0  ;;  %v808_v6 = vmax.f32 %v792_v21, 0.0  ;;  %v812_v16 = vmax.f32 %v796_v54, 0.0 }
 0x25b   :  { %v793_v33 = vadd.f32 %v785_v7, %v774_v48  ;;  %v794_v12 = vadd.f32 %v785_v7, %v775_v50  ;;  %v813_v3 = vmax.f32 %v797_v32, 0.0  ;;  %v814_v37 = vmax.f32 %v798_v61, 0.0 }
 0x25c   :  { %v815_v23 = vmax.f32 %v799_v63, 0.0  ;;  %v816_v31 = vmax.f32 %v2369_v41, 0.0  ;;  %v817_v7 = vmax.f32 %v2373_v55, 0.0  ;;  %v818_v59 = vmax.f32 %v2375_v9, 0.0 }
 0x25d   :  { %v809_v45 = vmax.f32 %v793_v33, 0.0  ;;  %v810_v28 = vmax.f32 %v794_v12, 0.0  ;;  %v2389_v47 = vperm.slane %v867_v57, 1  ;;  %v2396_v61 = vperm.slane %v867_v57, 2 }
 0x261   :  { %894 = vmatmul.f32.gmra.mxu0 %v804_v46  ;;  %959 = vmatmul.f32.gmra.mxu1 %v804_v46 }
 0x262   :  { %1024 = vmatmul.f32.gmra.mxu2 %v804_v46 }
 0x269   :  { %897 = vmatmul.f32.gmra.mxu0 %v805_v26  ;;  %962 = vmatmul.f32.gmra.mxu1 %v805_v26 }
 0x26a   :  { %1027 = vmatmul.f32.gmra.mxu2 %v805_v26 }
 0x271   :  { %900 = vmatmul.f32.gmra.mxu0 %v806_v35  ;;  %965 = vmatmul.f32.gmra.mxu1 %v806_v35 }
 0x272   :  { %1030 = vmatmul.f32.gmra.mxu2 %v806_v35 }
 0x279   :  { %903 = vmatmul.f32.gmra.mxu0 %v807_v15  ;;  %968 = vmatmul.f32.gmra.mxu1 %v807_v15 }
 0x27a   :  { %1033 = vmatmul.f32.gmra.mxu2 %v807_v15 }
 0x281   :  { %906 = vmatmul.f32.gmra.mxu0 %v808_v6  ;;  %971 = vmatmul.f32.gmra.mxu1 %v808_v6 }
 0x282   :  { %1036 = vmatmul.f32.gmra.mxu2 %v808_v6 }
 0x289   :  { %909 = vmatmul.f32.gmra.mxu0 %v809_v45  ;;  %974 = vmatmul.f32.gmra.mxu1 %v809_v45 }
 0x28a   :  { %1039 = vmatmul.f32.gmra.mxu2 %v809_v45 }
 0x291   :  { %912 = vmatmul.f32.gmra.mxu0 %v810_v28  ;;  %977 = vmatmul.f32.gmra.mxu1 %v810_v28 }
 0x292   :  { %1042 = vmatmul.f32.gmra.mxu2 %v810_v28 }
 0x299   :  { %915 = vmatmul.f32.gmra.mxu0 %v811_v38  ;;  %980 = vmatmul.f32.gmra.mxu1 %v811_v38 }
 0x29a   :  { %1045 = vmatmul.f32.gmra.mxu2 %v811_v38 }
 0x2a1   :  { %918 = vmatmul.f32.gmra.mxu0 %v812_v16  ;;  %983 = vmatmul.f32.gmra.mxu1 %v812_v16 }
 0x2a2   :  { %1048 = vmatmul.f32.gmra.mxu2 %v812_v16 }
 0x2a9   :  { %921 = vmatmul.f32.gmra.mxu0 %v813_v3  ;;  %986 = vmatmul.f32.gmra.mxu1 %v813_v3 }
 0x2aa   :  { %1051 = vmatmul.f32.gmra.mxu2 %v813_v3 }
 0x2b1   :  { %924 = vmatmul.f32.gmra.mxu0 %v814_v37  ;;  %989 = vmatmul.f32.gmra.mxu1 %v814_v37 }
 0x2b2   :  { %1054 = vmatmul.f32.gmra.mxu2 %v814_v37 }
 0x2b9   :  { %927 = vmatmul.f32.gmra.mxu0 %v815_v23  ;;  %992 = vmatmul.f32.gmra.mxu1 %v815_v23 }
 0x2ba   :  { %1057 = vmatmul.f32.gmra.mxu2 %v815_v23 }
 0x2c1   :  { %930 = vmatmul.f32.gmra.mxu0 %v816_v31  ;;  %995 = vmatmul.f32.gmra.mxu1 %v816_v31 }
 0x2c2   :  { %1060 = vmatmul.f32.gmra.mxu2 %v816_v31 }
 0x2c9   :  { %933 = vmatmul.f32.gmra.mxu0 %v817_v7  ;;  %998 = vmatmul.f32.gmra.mxu1 %v817_v7 }
 0x2ca   :  { %1063 = vmatmul.f32.gmra.mxu2 %v817_v7  ;;  %v869_v7 = vperm.slane %v867_v57, 0 }
 0x2d1   :  { %936 = vmatmul.f32.gmra.mxu0 %v818_v59  ;;  %1001 = vmatmul.f32.gmra.mxu1 %v818_v59 }
 0x2d2   :  { %1066 = vmatmul.f32.gmra.mxu2 %v818_v59 }
 0x2d6   :  { %v2391_v14 = vpop.f32.mrf.mxu0  ;;  %v957_v54 = vpop.f32.mrf.mxu1 }
 0x2d7   :  { %v2394_v32 = vadd.f32 %v957_v54, %v2389_v47 }
 0x2dd   :  { %v1022_v63 = vpop.f32.mrf.mxu2 }
 0x2de   :  { %v2399_v41 = vadd.f32 %v1022_v63, %v2396_v61  ;;  %v2401_v18 = vpop.f32.mrf.mxu0  ;;  %v960_v29 = vpop.f32.mrf.mxu1 }
 0x2df   :  { %v2404_v52 = vadd.f32 %v960_v29, %v2389_v47 }
 0x2e5   :  { %v1025_v55 = vpop.f32.mrf.mxu2 }
 0x2e6   :  { %v2407_v9 = vadd.f32 %v1025_v55, %v2396_v61  ;;  %v2409_v46 = vpop.f32.mrf.mxu0  ;;  %v963_v34 = vpop.f32.mrf.mxu1 }
 0x2e7   :  { %v2412_v25 = vadd.f32 %v963_v34, %v2389_v47 }
 0x2ed   :  { %v1028_v26 = vpop.f32.mrf.mxu2 }
 0x2ee   :  { %v2415_v24 = vadd.f32 %v1028_v26, %v2396_v61  ;;  %v901_v11 = vpop.f32.mrf.mxu0  ;;  %v966_v35 = vpop.f32.mrf.mxu1 }
 0x2ef   :  { %v2418_v53 = vadd.f32 %v966_v35, %v2389_v47 }
 0x2f5   :  { %v1031_v20 = vpop.f32.mrf.mxu2 }
 0x2f6   :  { %v2421_v15 = vadd.f32 %v1031_v20, %v2396_v61  ;;  %v904_v44 = vpop.f32.mrf.mxu0  ;;  %v969_v21 = vpop.f32.mrf.mxu1 }
 0x2f7   :  { %v2424_v6 = vadd.f32 %v969_v21, %v2389_v47 }
 0x2fd   :  { %v1034_v48 = vpop.f32.mrf.mxu2 }
 0x2fe   :  { %v2427_v33 = vadd.f32 %v1034_v48, %v2396_v61  ;;  %v907_v45 = vpop.f32.mrf.mxu0 }
 0x2ff   :  { %v908_v48 = vadd.f32 %v907_v45, %v869_v7  ;;  %v1436_v45 = vld [vmem:[#allocation2 + $0x10] sm:$0xff] }
 0x306   :  { %v910_v50 = vpop.f32.mrf.mxu0 }
 0x307   :  { %v911_v21 = vadd.f32 %v910_v50, %v869_v7  ;;  %v893_v50 = vadd.f32 %v2391_v14, %v869_v7  ;;  %v1443_v14 = vld [vmem:[#allocation2 + $0x40] sm:$0xff] }
 0x30e   :  { %v913_v12 = vpop.f32.mrf.mxu0 }
 0x30f   :  { %v914_v20 = vadd.f32 %v913_v12, %v869_v7  ;;  %v896_v12 = vadd.f32 %v2401_v18, %v869_v7  ;;  %v1441_v18 = vld [vmem:[#allocation2 + $0x30] sm:$0xff] }
 0x316   :  { %v916_v28 = vpop.f32.mrf.mxu0 }
 0x317   :  { %v917_v57 = vadd.f32 %v916_v28, %v869_v7  ;;  %v1438_v28 = vld [vmem:[#allocation2 + $0x18] sm:$0xff] }
 0x31e   :  { %v919_v38 = vpop.f32.mrf.mxu0 }
 0x31f   :  { %v920_v35 = vadd.f32 %v919_v38, %v869_v7  ;;  %v899_v38 = vadd.f32 %v2409_v46, %v869_v7  ;;  %v1439_v46 = vld [vmem:[#allocation2 + $0x20] sm:$0xff] }
 0x326   :  { %v922_v16 = vpop.f32.mrf.mxu0 }
 0x327   :  { %v923_v26 = vadd.f32 %v922_v16, %v869_v7  ;;  %v902_v16 = vadd.f32 %v901_v11, %v869_v7  ;;  %v1437_v11 = vld [vmem:[#allocation2 + $0x8] sm:$0xff] }
 0x32e   :  { %v925_v3 = vpop.f32.mrf.mxu0 }
 0x32f   :  { %v926_v34 = vadd.f32 %v925_v3, %v869_v7  ;;  %v905_v3 = vadd.f32 %v904_v44, %v869_v7  ;;  %v1435_v44 = vld [vmem:[#allocation2] sm:$0xff] }
 0x336   :  { %v928_v37 = vpop.f32.mrf.mxu0 }
 0x337   :  { %v929_v55 = vadd.f32 %v928_v37, %v869_v7  ;;  %v1440_v37 = vld [vmem:[#allocation2 + $0x28] sm:$0xff] }
 0x33e   :  { %v931_v23 = vpop.f32.mrf.mxu0 }
 0x33f   :  { %v932_v29 = vadd.f32 %v931_v23, %v869_v7  ;;  %v1442_v23 = vld [vmem:[#allocation2 + $0x38] sm:$0xff] }
 0x346   :  { %v934_v31 = vpop.f32.mrf.mxu0 }
 0x347   :  { %v935_v63 = vadd.f32 %v934_v31, %v869_v7  ;;  %v1444_v31 = vld [vmem:[#allocation2 + $0x48] sm:$0xff] }
 0x34e   :  { %v937_v59 = vpop.f32.mrf.mxu0 }
 0x34f   :  { %v938_v54 = vadd.f32 %v937_v59, %v869_v7  ;;  %v1445_v7 = vld [vmem:[#allocation2 + $0x50] sm:$0xff]  ;;  %v1446_v59 = vld [vmem:[#allocation2 + $0x58] sm:$0xff] }
 0x351   :  { %1070 = vmatpush.msra.mxu0 %v938_v54  ;;  %1406 = vmatpush.msrb.mxu3 %v938_v54  ;;  %v1447_v54 = vld [vmem:[#allocation2 + $0x60] sm:$0xff] }
 0x353   :  { %1071 = vmatpush.msra.mxu0 %v935_v63  ;;  %1407 = vmatpush.msrb.mxu3 %v935_v63  ;;  %v1448_v63 = vld [vmem:[#allocation2 + $0x68] sm:$0xff] }
 0x355   :  { %1072 = vmatpush.msra.mxu0 %v932_v29  ;;  %1408 = vmatpush.msrb.mxu3 %v932_v29  ;;  %v1449_v29 = vld [vmem:[#allocation2 + $0x70] sm:$0xff] }
 0x357   :  { %1073 = vmatpush.msra.mxu0 %v929_v55  ;;  %1409 = vmatpush.msrb.mxu3 %v929_v55  ;;  %v1450_v55 = vld [vmem:[#allocation2 + $0x78] sm:$0xff] }
 0x359   :  { %1074 = vmatpush.msra.mxu0 %v926_v34  ;;  %1410 = vmatpush.msrb.mxu3 %v926_v34  ;;  %v1135_v34 = vmul.f32 %v2394_v32, %v1941_v56 }
 0x35b   :  { %1075 = vmatpush.msra.mxu0 %v923_v26  ;;  %1411 = vmatpush.msrb.mxu3 %v923_v26 }
 0x35d   :  { %1076 = vmatpush.msra.mxu0 %v920_v35  ;;  %1412 = vmatpush.msrb.mxu3 %v920_v35  ;;  %v972_v35 = vpop.f32.mrf.mxu1 }
 0x35f   :  { %1077 = vmatpush.msra.mxu0 %v917_v57  ;;  %1413 = vmatpush.msrb.mxu3 %v917_v57 }
 0x361   :  { %1078 = vmatpush.msra.mxu0 %v914_v20  ;;  %1414 = vmatpush.msrb.mxu3 %v914_v20 }
 0x363   :  { %1079 = vmatpush.msra.mxu0 %v911_v21  ;;  %1415 = vmatpush.msrb.mxu3 %v911_v21  ;;  %v1137_v21 = vmul.f32 %v2412_v25, %v1945_v58 }
 0x365   :  { %1080 = vmatpush.msra.mxu0 %v908_v48  ;;  %1416 = vmatpush.msrb.mxu3 %v908_v48  ;;  %v975_v32 = vpop.f32.mrf.mxu1 }
 0x367   :  { %1081 = vmatpush.msra.mxu0 %v905_v3  ;;  %1417 = vmatpush.msrb.mxu3 %v905_v3  ;;  %v1037_v3 = vpop.f32.mrf.mxu2 }
 0x369   :  { %1082 = vmatpush.msra.mxu0 %v902_v16  ;;  %1418 = vmatpush.msrb.mxu3 %v902_v16 }
 0x36b   :  { %1083 = vmatpush.msra.mxu0 %v899_v38  ;;  %1419 = vmatpush.msrb.mxu3 %v899_v38  ;;  %v2630_v38 = vld [vmem:[#allocation11_spill] sm:$0xff] }
 0x36d   :  { %1084 = vmatpush.msra.mxu0 %v896_v12  ;;  %1420 = vmatpush.msrb.mxu3 %v896_v12  ;;  %v1136_v12 = vmul.f32 %v2404_v52, %v2630_v38  ;;  %v1139_v52 = vmul.f32 %v2424_v6, %v1949_v60 }
 0x36f   :  { %1085 = vmatpush.msra.mxu0 %v893_v50  ;;  %1421 = vmatpush.msrb.mxu3 %v893_v50  ;;  %v1040_v25 = vpop.f32.mrf.mxu2 }
 0x370   :  { %1086 = vmatmul.f32.vlgmr.msra.gmra.mxu0 %v1435_v44  ;;  %1092 = vmatmul.f32.vlgmr.msrb.gmra.mxu3 %v1436_v45 }
 0x378   :  { %1089 = vmatmul.f32.gmra.mxu0 %v1437_v11  ;;  %1095 = vmatmul.f32.gmra.mxu3 %v1438_v28 }
 0x380   :  { %1098 = vmatmul.f32.gmra.mxu3 %v1439_v46 }
 0x388   :  { %1101 = vmatmul.f32.gmra.mxu3 %v1440_v37  ;;  %v978_v37 = vpop.f32.mrf.mxu1 }
 0x390   :  { %1104 = vmatmul.f32.gmra.mxu3 %v1441_v18 }
 0x398   :  { %1107 = vmatmul.f32.gmra.mxu3 %v1442_v23 }
 0x3a0   :  { %1110 = vmatmul.f32.gmra.mxu3 %v1443_v14 }
 0x3a8   :  { %1113 = vmatmul.f32.gmra.mxu3 %v1444_v31  ;;  %v981_v31 = vpop.f32.mrf.mxu1 }
 0x3b0   :  { %1116 = vmatmul.f32.gmra.mxu3 %v1445_v7 }
 0x3b8   :  { %1119 = vmatmul.f32.gmra.mxu3 %v1446_v59  ;;  %v984_v59 = vpop.f32.mrf.mxu1 }
 0x3c0   :  { %1122 = vmatmul.f32.gmra.mxu3 %v1447_v54 }
 0x3c8   :  { %1125 = vmatmul.f32.gmra.mxu3 %v1448_v63 }
 0x3d0   :  { %1128 = vmatmul.f32.gmra.mxu3 %v1449_v29  ;;  %v987_v29 = vpop.f32.mrf.mxu1 }
 0x3d8   :  { %1131 = vmatmul.f32.gmra.mxu3 %v1450_v55 }
 0x3ed   :  { %v1087_v26 = vpop.f32.mrf.mxu0 }
 0x3ee   :  { %v1151_v57 = vsub.f32 %v1087_v26, %v1135_v34  ;;  %v990_v34 = vpop.f32.mrf.mxu1 }
 0x3f0   :  { %v2435_v20 = vadd.f32 %v1151_v57, %v2399_v41  ;;  %v2632_v41 = vld [vmem:[#allocation12_spill] sm:$0xff]  ;;  %v973_v57 = vadd.f32 %v972_v35, %v2389_v47 }
 0x3f1   :  { %v1138_v11 = vmul.f32 %v2418_v53, %v2632_v41 }
 0x3f2   :  { %2629 = vst [vmem:[#allocation19_spill] sm:$0xff] %v2435_v20 }
 0x3f3   :  { %v1093_v48 = vpop.f32.mrf.mxu3 }
 0x3f4   :  { %v1153_v16 = vsub.f32 %v1093_v48, %v1137_v21  ;;  %v976_v48 = vadd.f32 %v975_v32, %v2389_v47 }
 0x3f5   :  { %v1090_v50 = vpop.f32.mrf.mxu0 }
 0x3f6   :  { %v2442_v44 = vadd.f32 %v1153_v16, %v2415_v24  ;;  %v1152_v56 = vsub.f32 %v1090_v50, %v1136_v12  ;;  %v979_v12 = vadd.f32 %v978_v37, %v2389_v47  ;;  %v1140_v50 = vmul.f32 %v973_v57, %v1969_v22 }
 0x3f7   :  { %v985_v22 = vadd.f32 %v984_v59, %v2389_v47 }
 0x3f8   :  { %v2445_v45 = vadd.f32 %v1152_v56, %v2407_v9  ;;  %v1043_v9 = vpop.f32.mrf.mxu2  ;;  %v982_v56 = vadd.f32 %v981_v31, %v2389_v47  ;;  %v2634_v31 = vld [vmem:[#allocation13_spill] sm:$0xff] }
 0x3f9   :  { %v1185_v57 = vmul.f32 %v2442_v44, %v2634_v31 }
 0x3fa   :  { %2631 = vst [vmem:[#allocation11_spill] sm:$0xff] %v2445_v45  ;;  %v1184_v38 = vmul.f32 %v2445_v45, %v1965_v4 }
 0x3fb   :  { %v1096_v28 = vpop.f32.mrf.mxu3 }
 0x3fc   :  { %v1154_v58 = vsub.f32 %v1096_v28, %v1138_v11  ;;  %v1183_v11 = vmul.f32 %v2435_v20, %v1961_v2  ;;  %v1141_v28 = vmul.f32 %v976_v48, %v1975_v19  ;;  %v1221_v32 = vmul.f32 %v1184_v38, %v2445_v45  ;;  %v2635_v2 = vld [vmem:[#allocation17_spill] sm:$0xff]  ;;  %v2636_v19 = vld [vmem:[#allocation14_spill] sm:$0xff] }
 0x3fe   :  { %v2450_v46 = vadd.f32 %v1154_v58, %v2421_v15  ;;  %v1038_v58 = vadd.f32 %v1037_v3, %v2396_v61 }
 0x400   :  { %v1046_v7 = vpop.f32.mrf.mxu2  ;;  %v1186_v48 = vmul.f32 %v2450_v46, %v2636_v19 }
 0x403   :  { %v1099_v24 = vpop.f32.mrf.mxu3 }
 0x404   :  { %v1155_v18 = vsub.f32 %v1099_v24, %v1139_v52  ;;  %v1041_v52 = vadd.f32 %v1040_v25, %v2396_v61  ;;  %v2633_v24 = vld [vmem:[#allocation15_spill] sm:$0xff] }
 0x405   :  { %v1142_v37 = vmul.f32 %v979_v12, %v2633_v24  ;;  %v988_v12 = vadd.f32 %v987_v29, %v2389_v47  ;;  %v1047_v24 = vadd.f32 %v1046_v7, %v2396_v61  ;;  %v1223_v29 = vmul.f32 %v1186_v48, %v2450_v46 }
 0x406   :  { %v2455_v23 = vadd.f32 %v1155_v18, %v2427_v33  ;;  %v993_v33 = vpop.f32.mrf.mxu1  ;;  %v1220_v18 = vmul.f32 %v1183_v11, %v2435_v20  ;;  %v2637_v20 = vld [vmem:[#allocation16_spill] sm:$0xff] }
 0x408   :  { %v1049_v63 = vpop.f32.mrf.mxu2  ;;  %v1187_v31 = vmul.f32 %v2455_v23, %v2637_v20  ;;  %v994_v20 = vadd.f32 %v993_v33, %v2389_v47 }
 0x40b   :  { %v1102_v14 = vpop.f32.mrf.mxu3 }
 0x40c   :  { %v1156_v35 = vsub.f32 %v1102_v14, %v1140_v50  ;;  %v1143_v14 = vmul.f32 %v982_v56, %v2635_v2  ;;  %v1199_v50 = vadd.f32 %v1184_v38, %v1183_v11  ;;  %v1050_v11 = vadd.f32 %v1049_v63, %v2396_v61 }
 0x40e   :  { %v996_v41 = vpop.f32.mrf.mxu1  ;;  %v2488_v45 = vadd.f32 %v1156_v35, %v1038_v58  ;;  %v991_v35 = vadd.f32 %v990_v34, %v2389_v47  ;;  %v2638_v58 = vld [vmem:[#allocation18_spill] sm:$0xff]  ;;  %v1145_v34 = vmul.f32 %v988_v12, %v2011_v10 }
 0x40f   :  { %v997_v2 = vadd.f32 %v996_v41, %v2389_v47  ;;  %v1147_v41 = vmul.f32 %v994_v20, %v2055_v42 }
 0x410   :  { %v1052_v55 = vpop.f32.mrf.mxu2  ;;  %v1188_v7 = vmul.f32 %v2488_v45, %v1995_v8 }
 0x411   :  { %v1053_v8 = vadd.f32 %v1052_v55, %v2396_v61 }
 0x412   :  { %v1225_v10 = vmul.f32 %v1188_v7, %v2488_v45 }
 0x413   :  { %v1105_v53 = vpop.f32.mrf.mxu3 }
 0x414   :  { %v1157_v4 = vsub.f32 %v1105_v53, %v1141_v28  ;;  %v1044_v53 = vadd.f32 %v1043_v9, %v2396_v61  ;;  %v1236_v28 = vadd.f32 %v1221_v32, %v1220_v18  ;;  %v1144_v9 = vmul.f32 %v985_v22, %v2638_v58 }
 0x415   :  { %v1224_v18 = vmul.f32 %v1187_v31, %v2455_v23 }
 0x416   :  { %v2495_v56 = vadd.f32 %v1157_v4, %v1041_v52  ;;  %v999_v52 = vpop.f32.mrf.mxu1 }
 0x418   :  { %v2459_v60 = vpop.f32.mrf.mxu2  ;;  %v1189_v22 = vmul.f32 %v2495_v56, %v2008_v36 }
 0x419   :  { %v1056_v36 = vadd.f32 %v2459_v60, %v2396_v61  ;;  %v1148_v60 = vmul.f32 %v997_v2, %v2096_v43 }
 0x41b   :  { %v1108_v54 = vpop.f32.mrf.mxu3 }
 0x41c   :  { %v1158_v3 = vsub.f32 %v1108_v54, %v1142_v37  ;;  %v1222_v54 = vmul.f32 %v1185_v57, %v2442_v44  ;;  %v1200_v37 = vadd.f32 %v1199_v50, %v1185_v57 }
 0x41e   :  { %v2504_v32 = vadd.f32 %v1158_v3, %v1044_v53  ;;  %v1201_v4 = vadd.f32 %v1200_v37, %v1186_v48  ;;  %v1002_v43 = vpop.f32.mrf.mxu1 }
 0x420   :  { %v2464_v21 = vpop.f32.mrf.mxu2  ;;  %v1190_v19 = vmul.f32 %v2504_v32, %v2017_v13 }
 0x421   :  { %v1059_v42 = vadd.f32 %v2464_v21, %v2396_v61 }
 0x423   :  { %v1111_v15 = vpop.f32.mrf.mxu3 }
 0x424   :  { %v1159_v38 = vsub.f32 %v1111_v15, %v1143_v14  ;;  %v1237_v15 = vadd.f32 %v1236_v28, %v1222_v54  ;;  %v1146_v14 = vmul.f32 %v991_v35, %v2035_v62  ;;  %v1226_v62 = vmul.f32 %v1189_v22, %v2495_v56 }
 0x425   :  { %v1000_v28 = vadd.f32 %v999_v52, %v2389_v47 }
 0x426   :  { %v2512_v57 = vadd.f32 %v1159_v38, %v1047_v24  ;;  %v1238_v50 = vadd.f32 %v1237_v15, %v1223_v29 }
 0x427   :  { %v1149_v21 = vmul.f32 %v1000_v28, %v2140_v5 }
 0x428   :  { %v1061_v59 = vpop.f32.mrf.mxu2  ;;  %v1191_v12 = vmul.f32 %v2512_v57, %v2043_v1 }
 0x42a   :  { %v1228_v37 = vmul.f32 %v1191_v12, %v2512_v57 }
 0x42b   :  { %v2457_v26 = vpop.f32.mrf.mxu3 }
 0x42c   :  { %v1160_v63 = vsub.f32 %v2457_v26, %v1144_v9  ;;  %v1202_v26 = vadd.f32 %v1201_v4, %v1187_v31 }
 0x42e   :  { %v2523_v3 = vadd.f32 %v1160_v63, %v1050_v11  ;;  %v1203_v53 = vadd.f32 %v1202_v26, %v1188_v7 }
 0x430   :  { %v1064_v13 = vpop.f32.mrf.mxu2  ;;  %v1204_v11 = vadd.f32 %v1203_v53, %v1189_v22  ;;  %v1192_v35 = vmul.f32 %v2523_v3, %v2085_v39 }
 0x431   :  { %v1065_v20 = vadd.f32 %v1064_v13, %v2396_v61 }
 0x432   :  { %v1205_v9 = vadd.f32 %v1204_v11, %v1190_v19  ;;  %v1229_v63 = vmul.f32 %v1192_v35, %v2523_v3 }
 0x433   :  { %v2461_v6 = vpop.f32.mrf.mxu3 }
 0x434   :  { %v1161_v33 = vsub.f32 %v2461_v6, %v1145_v34  ;;  %v1239_v6 = vadd.f32 %v1238_v50, %v1224_v18  ;;  %v1206_v52 = vadd.f32 %v1205_v9, %v1191_v12  ;;  %v1003_v18 = vadd.f32 %v1002_v43, %v2389_v47 }
 0x436   :  { %v2531_v24 = vadd.f32 %v1161_v33, %v1053_v8  ;;  %v1240_v38 = vadd.f32 %v1239_v6, %v1225_v10  ;;  %v1207_v22 = vadd.f32 %v1206_v52, %v1192_v35  ;;  %v1150_v10 = vmul.f32 %v1003_v18, %v2162_v17 }
 0x438   :  { %v1241_v58 = vadd.f32 %v1240_v38, %v1226_v62  ;;  %v1193_v29 = vmul.f32 %v2531_v24, %v2113_v0  ;;  %v1067_v33 = vpop.f32.mrf.mxu2 }
 0x43a   :  { %v1230_v8 = vmul.f32 %v1193_v29, %v2531_v24  ;;  %v1208_v50 = vadd.f32 %v1207_v22, %v1193_v29  ;;  %v1403_v22 = vld [vmem:[%s2606_s8 + $0x1] sm:$0x1]  ;;  %s1534_s8 = smov [#allocation7]  }
 0x43b   :  { %v2467_v16 = vpop.f32.mrf.mxu3 }
 0x43c   :  { %v1162_v55 = vsub.f32 %v2467_v16, %v1146_v14  ;;  %v1227_v16 = vmul.f32 %v1190_v19, %v2504_v32 }
 0x43e   :  { %v2539_v54 = vadd.f32 %v1162_v55, %v1056_v36  ;;  %v1242_v39 = vadd.f32 %v1241_v58, %v1227_v16 }
 0x440   :  { %v1194_v34 = vmul.f32 %v2539_v54, %v2151_v30  ;;  %v1243_v0 = vadd.f32 %v1242_v39, %v1228_v37 }
 0x442   :  { %v1244_v14 = vadd.f32 %v1243_v0, %v1229_v63  ;;  %v1231_v26 = vmul.f32 %v1194_v34, %v2539_v54  ;;  %v1209_v19 = vadd.f32 %v1208_v50, %v1194_v34 }
 0x443   :  { %v1123_v25 = vpop.f32.mrf.mxu3 }
 0x444   :  { %v1163_v31 = vsub.f32 %v1123_v25, %v1147_v41  ;;  %v1062_v25 = vadd.f32 %v1061_v59, %v2396_v61  ;;  %v1245_v47 = vadd.f32 %v1244_v14, %v1230_v8  ;;  %v1404_v14 = vld [vmem:[%s2607_s9 + $0x1] sm:$0x1]  ;;  %s1336_s9 = sshll.u32 %s1534_s8, 4  ;;  %s1337_s9 = int_to_ptr.vmem [resolvable:$true] %s1336_s9 }
 0x446   :  { %v2545_v7 = vadd.f32 %v1163_v31, %v1059_v42  ;;  %v1246_v41 = vadd.f32 %v1245_v47, %v1231_v26 }
 0x448   :  { %v1195_v5 = vmul.f32 %v2545_v7, %v2182_v51  ;;  %v1068_v51 = vadd.f32 %v1067_v33, %v2396_v61 }
 0x44a   :  { %v1210_v6 = vadd.f32 %v1209_v19, %v1195_v5  ;;  %v2639_v19 = vld [vmem:[#allocation19_spill] sm:$0xff] }
 0x44b   :  { %v1126_v48 = vpop.f32.mrf.mxu3 }
 0x44c   :  { %v1164_v1 = vsub.f32 %v1126_v48, %v1148_v60  ;;  %v1232_v48 = vmul.f32 %v1195_v5, %v2545_v7 }
 0x44e   :  { %v2552_v4 = vadd.f32 %v1164_v1, %v1062_v25  ;;  %v1247_v12 = vadd.f32 %v1246_v41, %v1232_v48 }
 0x450   :  { %v1196_v30 = vmul.f32 %v2552_v4, %v2199_v40 }
 0x452   :  { %v1233_v53 = vmul.f32 %v1196_v30, %v2552_v4  ;;  %v1211_v28 = vadd.f32 %v1210_v6, %v1196_v30 }
 0x453   :  { %v1129_v15 = vpop.f32.mrf.mxu3 }
 0x454   :  { %v1165_v59 = vsub.f32 %v1129_v15, %v1149_v21  ;;  %v1248_v13 = vadd.f32 %v1247_v12, %v1233_v53 }
 0x456   :  { %v2558_v2 = vadd.f32 %v1165_v59, %v1065_v20 }
 0x458   :  { %v1197_v36 = vmul.f32 %v2558_v2, %v2213_v27 }
 0x45a   :  { %v1234_v40 = vmul.f32 %v1197_v36, %v2558_v2  ;;  %v1212_v31 = vadd.f32 %v1211_v28, %v1197_v36  ;;  %v2640_v36 = vld [vmem:[#allocation11_spill] sm:$0xff] }
 0x45b   :  { %v1132_v55 = vpop.f32.mrf.mxu3 }
 0x45c   :  { %v1166_v62 = vsub.f32 %v1132_v55, %v1150_v10  ;;  %v1249_v38 = vadd.f32 %v1248_v13, %v1234_v40 }
 0x45e   :  { %v1182_v17 = vadd.f32 %v1166_v62, %v1068_v51 }
 0x460   :  { %v1198_v60 = vmul.f32 %v1182_v17, %v2251_v49 }
 0x462   :  { %v1213_v11 = vadd.f32 %v1212_v31, %v1198_v60  ;;  %v1235_v27 = vmul.f32 %v1198_v60, %v1182_v17 }
 0x464   :  { %v1214_v16 = vrot.slane %v1213_v11, 4  ;;  %v1250_v61 = vadd.f32 %v1249_v38, %v1235_v27 }
 0x466   :  { %v1215_v42 = vadd.f32 %v1214_v16, %v1213_v11  ;;  %v1251_v35 = vrot.slane %v1250_v61, 4 }
 0x468   :  { %v1216_v1 = vrot.slane %v1215_v42, 2  ;;  %v1252_v58 = vadd.f32 %v1251_v35, %v1250_v61 }
 0x46a   :  { %v1217_v9 = vadd.f32 %v1216_v1, %v1215_v42  ;;  %v1253_v37 = vrot.slane %v1252_v58, 2 }
 0x46c   :  { %v1218_v25 = vrot.slane %v1217_v9, 1  ;;  %v1254_v43 = vadd.f32 %v1253_v37, %v1252_v58 }
 0x46e   :  { %v1219_v29 = vadd.f32 %v1218_v25, %v1217_v9  ;;  %v1255_v21 = vrot.slane %v1254_v43, 1 }
 0x470   :  { %v1256_v20 = vadd.f32 %v1255_v21, %v1254_v43  ;;  %v1257_v39 = vmul.f32 %v1219_v29, %v1219_v29 }
 0x472   :  { %v1258_v52 = vsub.f32 %v1256_v20, %v1257_v39 }
 0x474   :  { %v1259_v15 = vmax.f32 %v1258_v52, 0.0 }
 0x476   :  { %v1262_v49 = vadd.f32 1e-05, %v1259_v15 }
 0x478   :  { %1433 = vrsqrt.f32 %v1262_v49  ;;  %vm1269_vm6 = vweird.f32 %v1262_v49 }
 0x47e   :  { %v1434_v63 = vpop.eup %1433 }
 0x47f   :  { %v1264_v34 = vmul.f32 %v1434_v63, %v1262_v49  ;;  %vm1270_vm5 = vweird.f32 %v1434_v63 }
 0x480   :  { %vm1271_vm7 = vmor %vm1269_vm6, %vm1270_vm5 }
 0x481   :  { %v1265_v59 = vmul.f32 %v1434_v63, %v1264_v34 }
 0x483   :  { %v1266_v18 = vmul.f32 0.5, %v1265_v59 }
 0x485   :  { %v1267_v0 = vsub.f32 1.5, %v1266_v18 }
 0x487   :  { %v1268_v8 = vmul.f32 %v1434_v63, %v1267_v0 }
 0x489   :  { %v1272_v5 = vsel %vm1271_vm7, %v1434_v63, %v1268_v8 }
 0x48a   :  { %v1273_v33 = vmul.f32 %v1403_v22, %v1272_v5 }
 0x48c   :  { %v1276_v50 = vmul.f32 %v1273_v33, %v1219_v29  ;;  %v1279_v26 = vperm.slane %v1273_v33, 0 }
 0x48e   :  { %v1277_v30 = vsub.f32 %v1404_v14, %v1276_v50  ;;  %v1296_v10 = vmul.f32 %v1279_v26, %v1182_v17  ;;  %v1281_v48 = vmul.f32 %v1279_v26, %v2639_v19  ;;  %v1282_v51 = vmul.f32 %v1279_v26, %v2640_v36 }
 0x48f   :  { %v1283_v55 = vmul.f32 %v1279_v26, %v2442_v44  ;;  %v1284_v6 = vmul.f32 %v1279_v26, %v2450_v46  ;;  %v1295_v53 = vmul.f32 %v1279_v26, %v2558_v2  ;;  %v1285_v12 = vmul.f32 %v1279_v26, %v2455_v23 }
 0x490   :  { %v1298_v47 = vperm.slane %v1277_v30, 0  ;;  %v1286_v17 = vmul.f32 %v1279_v26, %v2488_v45  ;;  %v1287_v31 = vmul.f32 %v1279_v26, %v2495_v56  ;;  %v1288_v44 = vmul.f32 %v1279_v26, %v2504_v32 }
 0x491   :  { %v1289_v46 = vmul.f32 %v1279_v26, %v2512_v57  ;;  %v1290_v23 = vmul.f32 %v1279_v26, %v2523_v3  ;;  %v1291_v45 = vmul.f32 %v1279_v26, %v2531_v24  ;;  %v1292_v56 = vmul.f32 %v1279_v26, %v2539_v54 }
 0x492   :  { %v1315_v41 = vadd.f32 %v1298_v47, %v1296_v10  ;;  %v1300_v62 = vadd.f32 %v1298_v47, %v1281_v48  ;;  %v1301_v28 = vadd.f32 %v1298_v47, %v1282_v51  ;;  %v1302_v40 = vadd.f32 %v1298_v47, %v1283_v55 }
 0x493   :  { %v1303_v13 = vadd.f32 %v1298_v47, %v1284_v6  ;;  %v1304_v60 = vadd.f32 %v1298_v47, %v1285_v12  ;;  %v1305_v38 = vadd.f32 %v1298_v47, %v1286_v17  ;;  %v1314_v11 = vadd.f32 %v1298_v47, %v1295_v53 }
 0x494   :  { %1331 = vst [vmem:[#allocation7 + $0x78] sm:$0xff] %v1315_v41  ;;  %v1306_v2 = vadd.f32 %v1298_v47, %v1287_v31  ;;  %v1307_v27 = vadd.f32 %v1298_v47, %v1288_v44  ;;  %v1308_v16 = vadd.f32 %v1298_v47, %v1289_v46  ;;  %v1309_v61 = vadd.f32 %v1298_v47, %v1290_v23 }
 0x495   :  { %1316 = vst [vmem:[#allocation7] sm:$0xff] %v1300_v62  ;;  %v1293_v32 = vmul.f32 %v1279_v26, %v2545_v7  ;;  %v1310_v42 = vadd.f32 %v1298_v47, %v1291_v45  ;;  %v1294_v57 = vmul.f32 %v1279_v26, %v2552_v4  ;;  %v1311_v35 = vadd.f32 %v1298_v47, %v1292_v56 }
 0x496   :  { %1317 = vst [vmem:[#allocation7 + $0x8] sm:$0xff] %v1301_v28 }
 0x497   :  { %1318 = vst [vmem:[#allocation7 + $0x10] sm:$0xff] %v1302_v40  ;;  %v1312_v1 = vadd.f32 %v1298_v47, %v1293_v32  ;;  %v1313_v3 = vadd.f32 %v1298_v47, %v1294_v57 }
 0x498   :  { %1319 = vst [vmem:[#allocation7 + $0x18] sm:$0xff] %v1303_v13 }
 0x499   :  { %1320 = vst [vmem:[#allocation7 + $0x20] sm:$0xff] %v1304_v60 }
 0x49a   :  { %1321 = vst [vmem:[#allocation7 + $0x28] sm:$0xff] %v1305_v38 }
 0x49b   :  { %1322 = vst [vmem:[#allocation7 + $0x30] sm:$0xff] %v1306_v2 }
 0x49c   :  { %1323 = vst [vmem:[#allocation7 + $0x38] sm:$0xff] %v1307_v27 }
 0x49d   :  { %1324 = vst [vmem:[#allocation7 + $0x40] sm:$0xff] %v1308_v16 }
 0x49e   :  { %1325 = vst [vmem:[#allocation7 + $0x48] sm:$0xff] %v1309_v61 }
 0x49f   :  { %1326 = vst [vmem:[#allocation7 + $0x50] sm:$0xff] %v1310_v42 }
 0x4a0   :  { %1327 = vst [vmem:[#allocation7 + $0x58] sm:$0xff] %v1311_v35 }
 0x4a1   :  { %1328 = vst [vmem:[#allocation7 + $0x60] sm:$0xff] %v1312_v1 }
 0x4a2   :  { %1329 = vst [vmem:[#allocation7 + $0x68] sm:$0xff] %v1313_v3 }
 0x4a3   :  { %1330 = vst [vmem:[#allocation7 + $0x70] sm:$0xff] %v1314_v11 }
 0x4a4   :  { %1344 = dma.vmem_to_hbm [thread:$0]  %s1337_s9, 2048, %s1339_s23, [#allocation4], %s1530_s21, %s1530_s21, %s1531_s22  }
 0x4a5   :  { %1527 = dma.done.wait [#allocation4], 2048  }
 0x4a6   :  { %1528 = vsyncadd [#allocation4], 4294965248 }
 0x4a7   :  { %1349 = vsyncpa [#allocation3], 1 }
 0x4a8   :  { %1350 = vsyncpa [#allocation6], 1 }
 0x4a9   :  { %1351 = vsyncpa [#allocation4], 1 }

</bundles_post_ra>
